<compile_context>
chip_gen: v7x
topology: tpu7x:2x2x1
jax: 0.10.0
libtpu: 0.0.40
codegen_flags: <defaults>
</compile_context>

<pallas_src>
import math
import numpy as np
import jax
import jax.numpy as jnp
from jax.experimental import pallas as pl
from jax.experimental.pallas import tpu as pltpu

_BLUR9 = tuple(c / 16.0 for c in (1., 2., 1., 2., 4., 2., 1., 2., 1.))


def _round_up(x, m):
    return ((x + m - 1) // m) * m


def _geometry(H, W, K, pad):
    """Flat stride-Wp layout constants shared by wrapper and kernel.

    Wp is padded so L = H*Wp is a multiple of 128 (lane-dense stores, aligned
    per-row tap offsets).  FLAT_PAD is the zero-extended flat length; its tail
    zeros provide the top/bottom conv halo when taps are realized as lane
    rotations (wrap-around of negative shifts lands in the zero tail).
    """
    req = 128 // math.gcd(H, 128)
    Wp = _round_up(W + 2 * pad, req)          # padded row stride (all stages)
    L = H * Wp                                # flat spatial length (valid: col<W)
    OFF0 = pad * Wp + pad                     # flat offset of interior pixel (0,0)
    offs = tuple(dh * Wp + dw for dh in range(K) for dw in range(K))
    FLAT_PAD = _round_up(offs[-1] + L, 128)
    assert FLAT_PAD >= L + OFF0               # negative-shift wrap must hit zeros
    return Wp, L, OFF0, offs, FLAT_PAD


# ---------------------------------------------------------------------------
# Fused kernel (NB batch elements per grid step, channels-major, lane rolls)
# ---------------------------------------------------------------------------
def make_fused_kernel(H, W, K, Cin, Cout, pad, NB, use_blur):
    Wp, L, OFF0, offs, FLAT_PAD = _geometry(H, W, K, pad)
    inv_hw = 1.0 / (H * W)
    NBC = NB * Cout
    # tap[j] = buf[(j + o) % FLAT_PAD]  ->  pltpu.roll by (FLAT_PAD - o)
    shifts_in = tuple((FLAT_PAD - o) % FLAT_PAD for o in offs)            # conv1
    shifts_mid = tuple((FLAT_PAD - (o - OFF0)) % FLAT_PAD for o in offs)  # blur/conv2

    def window(buf, s):
        v = buf if s == 0 else pltpu.roll(buf, s, axis=1)
        return v[:, :L]

    def conv(buf, shifts, w_ref, b_ref):
        # K*K shifted lane windows, one small MXU matmul per tap with the
        # batch-block-diagonal (NBC, rows(buf)) weight slice.
        acc = None
        for t, s in enumerate(shifts):
            y = jnp.dot(w_ref[t], window(buf, s),
                        preferred_element_type=jnp.float32)
            acc = y if acc is None else acc + y
        return acc + b_ref[...]

    def adain_lrelu(y, noise, nw, gamma, beta, mask):
        """NoiseInjection + InstanceNorm2d + style affine + LeakyReLU(0.2).

        Rows are (batch, channel) pairs; stride-pad columns carry junk that is
        excluded from the reductions via `mask`.
        """
        x = y + noise * nw
        mean = jnp.sum(x * mask, axis=1, keepdims=True) * inv_hw
        cen = x - mean
        var = jnp.sum(cen * cen * mask, axis=1, keepdims=True) * inv_hw
        normed = cen * jax.lax.rsqrt(var + 1e-5)
        out = gamma * normed + beta
        return jnp.maximum(out, 0.2 * out)          # LeakyReLU(0.2), no select

    def kernel(x_ref, w1_ref, b1_ref, noise_ref, nw1_ref, g1_ref, be1_ref,
               w2_ref, b2_ref, nw2_ref, g2_ref, be2_ref, mask_ref, out_ref):
        mask = mask_ref[...]                              # (1, L)
        noise = noise_ref[...]                            # (NBC, L)
        zpad = jnp.zeros((NBC, FLAT_PAD - L), jnp.float32)

        # ---- conv1: padded-flat input already carries its halo ----
        y = conv(x_ref[...], shifts_in, w1_ref, b1_ref)   # (NBC, L)

        if use_blur:
            # 3x3 binomial blur; masked interior + zero tail supply the halo.
            ybuf = jnp.concatenate([y * mask, zpad], axis=1)
            acc = None
            for c, s in zip(_BLUR9, shifts_mid):
                term = c * window(ybuf, s)
                acc = term if acc is None else acc + term
            y = acc

        h1 = adain_lrelu(y, noise, nw1_ref[...], g1_ref[...], be1_ref[...],
                         mask)

        # ---- conv2 on the masked mid activation (same implicit halo) ----
        hbuf = jnp.concatenate([h1 * mask, zpad], axis=1)
        y2 = conv(hbuf, shifts_mid, w2_ref, b2_ref)

        out = adain_lrelu(y2, noise, nw2_ref[...], g2_ref[...], be2_ref[...],
                          mask)
        out_ref[...] = out                                # (NBC, L) lane-dense

    return kernel


# ---------------------------------------------------------------------------
# StyleConvBlock forward (Pallas-backed), NCHW in / NCHW out
# ---------------------------------------------------------------------------
def style_conv_block_forward(x_nchw, style, noise_nchw, params, *, padding,
                             upsample, block_batch=2):
    p = params
    x = x_nchw.astype(jnp.float32)
    B = x.shape[0]
    Cout, Cin, K, _ = p['w1'].shape
    assert 2 * padding == K - 1, "flat stride-Wp layout needs 'same' convs"
    if upsample:
        assert K == 3 and padding == 1, "blur path assumes 3x3 / pad=1"
        x = jnp.repeat(jnp.repeat(x, 2, axis=2), 2, axis=3)        # nearest x2
    _, _, H, W = x.shape                    # conv-input == conv-output spatial

    NB = block_batch if B % block_batch == 0 else 1    # images per grid step
    Wp, L, OFF0, offs, FLAT_PAD = _geometry(H, W, K, padding)

    # ---- conv1 input: zero-padded image flattened with row stride Wp ----
    xpad = jnp.pad(x, ((0, 0), (0, 0), (padding, padding),
                       (padding, padding + Wp - (W + 2 * padding))))
    xflat = xpad.reshape(B, Cin, (H + 2 * padding) * Wp)
    xflat = jnp.pad(xflat, ((0, 0), (0, 0), (0, FLAT_PAD - xflat.shape[-1])))
    x1 = xflat.reshape(B * Cin, FLAT_PAD)

    # ---- lane-dense per-(batch, channel) auxiliaries ----
    noise = noise_nchw.astype(jnp.float32).reshape(B, 1, H, W)
    noise_flat = jnp.pad(noise, ((0, 0), (0, 0), (0, 0),
                                 (0, Wp - W))).reshape(B, 1, L)
    noise_bc = jnp.broadcast_to(noise_flat, (B, Cout, L)).reshape(B * Cout, L)
    mask = jnp.tile((jnp.arange(Wp) < W).astype(jnp.float32), H).reshape(1, L)

    style32 = style.astype(jnp.float32)

    def style_affine(sw, sb):                       # hoisted tiny XLA matmul
        sty = style32 @ sw.T + sb.reshape(1, -1)    # (B, 2*Cout)
        return (sty[:, :Cout].reshape(B * Cout, 1),
                sty[:, Cout:].reshape(B * Cout, 1))

    g1, be1 = style_affine(p['sw1'], p['sb1'])
    g2, be2 = style_affine(p['sw2'], p['sb2'])

    def w_blockdiag(w):        # (Cout, Cin, K, K) -> (K*K, NB*Cout, NB*Cin)
        co, ci = w.shape[0], w.shape[1]
        wt = jnp.transpose(w, (2, 3, 0, 1)).reshape(K * K, co, ci)
        eye = jnp.eye(NB, dtype=w.dtype)
        return jnp.einsum('bq,tij->tbiqj', eye, wt).reshape(
            K * K, NB * co, NB * ci)

    def tile_nb(v):            # (Cout, 1) -> (NB*Cout, 1)
        return jnp.tile(v.reshape(-1), (NB,)).reshape(NB * Cout, 1)

    kernel = make_fused_kernel(H, W, K, Cin, Cout, padding, NB,
                               use_blur=upsample)
    NBC = NB * Cout
    const2 = lambda g: (0, 0)
    const3 = lambda g: (0, 0, 0)
    per_g = lambda g: (g, 0)

    out_flat = pl.pallas_call(
        kernel,
        out_shape=jax.ShapeDtypeStruct((B * Cout, L), jnp.float32),
        grid_spec=pltpu.PrefetchScalarGridSpec(
            num_scalar_prefetch=0, grid=(B // NB,),
            in_specs=[
                pl.BlockSpec((NB * Cin, FLAT_PAD), per_g),      # padded-flat x
                pl.BlockSpec((K * K, NBC, NB * Cin), const3),   # w1 block-diag
                pl.BlockSpec((NBC, 1), const2),                 # b1
                pl.BlockSpec((NBC, L), per_g),                  # noise (tiled)
                pl.BlockSpec((NBC, 1), const2),                 # noise1 weight
                pl.BlockSpec((NBC, 1), per_g),                  # gamma1
                pl.BlockSpec((NBC, 1), per_g),                  # beta1
                pl.BlockSpec((K * K, NBC, NBC), const3),        # w2 block-diag
                pl.BlockSpec((NBC, 1), const2),                 # b2
                pl.BlockSpec((NBC, 1), const2),                 # noise2 weight
                pl.BlockSpec((NBC, 1), per_g),                  # gamma2
                pl.BlockSpec((NBC, 1), per_g),                  # beta2
                pl.BlockSpec((1, L), const2),                   # validity mask
            ],
            out_specs=pl.BlockSpec((NBC, L), per_g)),
        compiler_params=pltpu.CompilerParams(
            dimension_semantics=("parallel",)),
    )(x1, w_blockdiag(p['w1']), tile_nb(p['b1']), noise_bc, tile_nb(p['nw1']),
      g1, be1, w_blockdiag(p['w2']), tile_nb(p['b2']), tile_nb(p['nw2']),
      g2, be2, mask)

    # (B, Cout, H, Wp) -> drop the stride-padding columns -> NCHW.
    return out_flat.reshape(B, Cout, H, Wp)[:, :, :, :W]


# ---------------------------------------------------------------------------
# Deterministic parameter init (matches __init__ + EqualizedLR scaling)
# ---------------------------------------------------------------------------
def init_params(key, in_channel, out_channel, K, style_dim):
    ks = jax.random.split(key, 6)
    C = out_channel

    def eq_conv(k, cin, cout):
        w = jax.random.normal(k, (cout, cin, K, K), jnp.float32)   # normal_()
        w = w * math.sqrt(2.0 / (cin * K * K))                     # EqualizedLR
        b = jnp.zeros((cout, 1), jnp.float32)                      # bias zero_()
        return w, b

    def eq_noise(k, c):
        w = jax.random.normal(k, (1, c, 1, 1), jnp.float32)        # randn
        return (w * math.sqrt(2.0 / c)).reshape(c, 1)              # EqualizedLR

    def adain_style(k, c, d):
        w = jax.random.normal(k, (2 * c, d), jnp.float32)          # normal_()
        sw = w * math.sqrt(2.0 / d)                                 # EqualizedLR
        sb = jnp.concatenate([jnp.ones((c,), jnp.float32),
                              jnp.zeros((c,), jnp.float32)]).reshape(2 * c, 1)
        return sw, sb

    w1, b1 = eq_conv(ks[0], in_channel, C)
    nw1 = eq_noise(ks[1], C)
    sw1, sb1 = adain_style(ks[2], C, style_dim)
    w2, b2 = eq_conv(ks[3], C, C)
    nw2 = eq_noise(ks[4], C)
    sw2, sb2 = adain_style(ks[5], C, style_dim)
    return dict(w1=w1, b1=b1, nw1=nw1, sw1=sw1, sb1=sb1,
                w2=w2, b2=b2, nw2=nw2, sw2=sw2, sb2=sb2)


# ---------------------------------------------------------------------------
# Pure-JAX reference (mirrors the PyTorch forward) for verification
# ---------------------------------------------------------------------------
def _ref_conv(x, w, b, pad):
    y = jax.lax.conv_general_dilated(
        x, w, (1, 1), [(pad, pad), (pad, pad)],
        dimension_numbers=('NCHW', 'OIHW', 'NCHW'),
        precision=jax.lax.Precision.HIGHEST)
    return y + b.reshape(1, -1, 1, 1)


def _ref_blur(y):
    C = y.shape[1]
    k = jnp.array([[1., 2., 1.], [2., 4., 2.], [1., 2., 1.]], jnp.float32) / 16.
    kw = jnp.tile(k[None, None], (C, 1, 1, 1))                    # (C,1,3,3)
    return jax.lax.conv_general_dilated(
        y, kw, (1, 1), [(1, 1), (1, 1)],
        dimension_numbers=('NCHW', 'OIHW', 'NCHW'),
        feature_group_count=C, precision=jax.lax.Precision.HIGHEST)


def _ref_noise_adain_lrelu(y, noise, nw, style, sw, sb):
    C = y.shape[1]
    y = y + noise * nw.reshape(1, C, 1, 1)
    mean = y.mean(axis=(2, 3), keepdims=True)
    var = ((y - mean) ** 2).mean(axis=(2, 3), keepdims=True)
    yn = (y - mean) / jnp.sqrt(var + 1e-5)
    sty = style @ sw.T + sb.reshape(1, -1)
    gamma = sty[:, :C][:, :, None, None]
    beta = sty[:, C:][:, :, None, None]
    out = gamma * yn + beta
    return jnp.where(out >= 0, out, 0.2 * out)


def reference_forward(x, style, noise, params, *, padding, upsample):
    p = params
    x = x.astype(jnp.float32)
    if upsample:
        x = jnp.repeat(jnp.repeat(x, 2, axis=2), 2, axis=3)
        y = _ref_conv(x, p['w1'], p['b1'], padding)
        y = _ref_blur(y)
    else:
        y = _ref_conv(x, p['w1'], p['b1'], padding)
    y = _ref_noise_adain_lrelu(y, noise, p['nw1'], style, p['sw1'], p['sb1'])
    y = _ref_conv(y, p['w2'], p['b2'], padding)
    y = _ref_noise_adain_lrelu(y, noise, p['nw2'], style, p['sw2'], p['sb2'])
    return y


# ---------------------------------------------------------------------------
if __name__ == "__main__":
    B, Cin, Cout = 4, 4, 8
    H = W = 8
    K, pad, D = 3, 1, 64
    upsample = True   # module default (initial=False)

    key = jax.random.PRNGKey(0)
    kx, kn, ks, kp = jax.random.split(key, 4)
    x = jax.random.normal(kx, (B, Cin, H, W), jnp.float32)
    Ho, Wo = (2 * H, 2 * W) if upsample else (H, W)
    noise = jax.random.normal(kn, (B, 1, Ho, Wo), jnp.float32)
    style = jax.random.normal(ks, (B, D), jnp.float32)
    params = init_params(kp, Cin, Cout, K, D)

    out = style_conv_block_forward(x, style, noise, params,
                                   padding=pad, upsample=upsample)
    out = jax.block_until_ready(out)

    ref = reference_forward(x, style, noise, params,
                            padding=pad, upsample=upsample)
    np.testing.assert_allclose(np.asarray(out), np.asarray(ref),
                               rtol=5e-4, atol=5e-5)
    print("KERNEL_OK")
</pallas_src>

<mosaic_0001>
module attributes {stable_mosaic.version = 11 : i64} {
  func.func @kernel(%arg0: i32, %arg1: memref<8x512xf32, #tpu.memory_space<vmem>>, %arg2: memref<9x16x8xf32, #tpu.memory_space<vmem>>, %arg3: memref<16x1xf32, #tpu.memory_space<vmem>>, %arg4: memref<16x384xf32, #tpu.memory_space<vmem>>, %arg5: memref<16x1xf32, #tpu.memory_space<vmem>>, %arg6: memref<16x1xf32, #tpu.memory_space<vmem>>, %arg7: memref<16x1xf32, #tpu.memory_space<vmem>>, %arg8: memref<9x16x16xf32, #tpu.memory_space<vmem>>, %arg9: memref<16x1xf32, #tpu.memory_space<vmem>>, %arg10: memref<16x1xf32, #tpu.memory_space<vmem>>, %arg11: memref<16x1xf32, #tpu.memory_space<vmem>>, %arg12: memref<16x1xf32, #tpu.memory_space<vmem>>, %arg13: memref<1x384xf32, #tpu.memory_space<vmem>>, %arg14: memref<16x384xf32, #tpu.memory_space<vmem>>) attributes {dimension_semantics = [#tpu.dimension_semantics<parallel>], iteration_bounds = array<i64: 2>, scalar_prefetch = 0 : i64, scratch_operands = 0 : i64, tpu.core_type = #tpu.core_type<tc>, window_params = [{transform_indices = @transform_0, window_bounds = array<i64: 8, 512>}, {pipeline_mode = #tpu.pipeline_mode<synchronous>, transform_indices = @transform_1, window_bounds = array<i64: 9, 16, 8>}, {pipeline_mode = #tpu.pipeline_mode<synchronous>, transform_indices = @transform_2, window_bounds = array<i64: 16, 1>}, {transform_indices = @transform_3, window_bounds = array<i64: 16, 384>}, {pipeline_mode = #tpu.pipeline_mode<synchronous>, transform_indices = @transform_4, window_bounds = array<i64: 16, 1>}, {transform_indices = @transform_5, window_bounds = array<i64: 16, 1>}, {transform_indices = @transform_6, window_bounds = array<i64: 16, 1>}, {pipeline_mode = #tpu.pipeline_mode<synchronous>, transform_indices = @transform_7, window_bounds = array<i64: 9, 16, 16>}, {pipeline_mode = #tpu.pipeline_mode<synchronous>, transform_indices = @transform_8, window_bounds = array<i64: 16, 1>}, {pipeline_mode = #tpu.pipeline_mode<synchronous>, transform_indices = @transform_9, window_bounds = array<i64: 16, 1>}, {transform_indices = @transform_10, window_bounds = array<i64: 16, 1>}, {transform_indices = @transform_11, window_bounds = array<i64: 16, 1>}, {pipeline_mode = #tpu.pipeline_mode<synchronous>, transform_indices = @transform_12, window_bounds = array<i64: 1, 384>}, {transform_indices = @transform_13, window_bounds = array<i64: 16, 384>}]} {
    %c0 = arith.constant 0 : index
    %c0_0 = arith.constant 0 : index
    %0 = vector.load %arg13[%c0, %c0_0] : memref<1x384xf32, #tpu.memory_space<vmem>>, vector<1x384xf32>
    %c0_1 = arith.constant 0 : index
    %c0_2 = arith.constant 0 : index
    %1 = vector.load %arg4[%c0_1, %c0_2] : memref<16x384xf32, #tpu.memory_space<vmem>>, vector<16x384xf32>
    %cst = arith.constant 0.000000e+00 : f32
    %2 = vector.broadcast %cst : f32 to vector<16x128xf32>
    %c0_3 = arith.constant 0 : index
    %c0_4 = arith.constant 0 : index
    %3 = vector.load %arg1[%c0_3, %c0_4] : memref<8x512xf32, #tpu.memory_space<vmem>>, vector<8x512xf32>
    %c0_5 = arith.constant 0 : index
    %c0_6 = arith.constant 0 : index
    %c0_7 = arith.constant 0 : index
    %4 = vector.load %arg2[%c0_5, %c0_6, %c0_7] : memref<9x16x8xf32, #tpu.memory_space<vmem>>, vector<1x16x8xf32>
    %5 = vector.shape_cast %4 : vector<1x16x8xf32> to vector<16x8xf32>
    %6 = vector.extract_strided_slice %3 {offsets = [0, 0], sizes = [8, 384], strides = [1, 1]} : vector<8x512xf32> to vector<8x384xf32>
    %cst_8 = arith.constant dense<0.000000e+00> : vector<16x384xf32>
    %7 = tpu.matmul %5, %6, %cst_8 {dimension_numbers = #tpu.dot_dimension_numbers<[1], [0], [0], [1], [0, 0, 1, 1], [], []>} : vector<16x8xf32>, vector<8x384xf32>, vector<16x384xf32> -> vector<16x384xf32>
    %c1 = arith.constant 1 : index
    %c0_9 = arith.constant 0 : index
    %c0_10 = arith.constant 0 : index
    %8 = vector.load %arg2[%c1, %c0_9, %c0_10] : memref<9x16x8xf32, #tpu.memory_space<vmem>>, vector<1x16x8xf32>
    %9 = vector.shape_cast %8 : vector<1x16x8xf32> to vector<16x8xf32>
    %c511_i32 = arith.constant 511 : i32
    %10 = tpu.dynamic_rotate %3 by %c511_i32 dim 1 : vector<8x512xf32>, i32 -> vector<8x512xf32>
    %11 = vector.extract_strided_slice %10 {offsets = [0, 0], sizes = [8, 384], strides = [1, 1]} : vector<8x512xf32> to vector<8x384xf32>
    %cst_11 = arith.constant dense<0.000000e+00> : vector<16x384xf32>
    %12 = tpu.matmul %9, %11, %cst_11 {dimension_numbers = #tpu.dot_dimension_numbers<[1], [0], [0], [1], [0, 0, 1, 1], [], []>} : vector<16x8xf32>, vector<8x384xf32>, vector<16x384xf32> -> vector<16x384xf32>
    %13 = arith.addf %7, %12 : vector<16x384xf32>
    %c2 = arith.constant 2 : index
    %c0_12 = arith.constant 0 : index
    %c0_13 = arith.constant 0 : index
    %14 = vector.load %arg2[%c2, %c0_12, %c0_13] : memref<9x16x8xf32, #tpu.memory_space<vmem>>, vector<1x16x8xf32>
    %15 = vector.shape_cast %14 : vector<1x16x8xf32> to vector<16x8xf32>
    %c510_i32 = arith.constant 510 : i32
    %16 = tpu.dynamic_rotate %3 by %c510_i32 dim 1 : vector<8x512xf32>, i32 -> vector<8x512xf32>
    %17 = vector.extract_strided_slice %16 {offsets = [0, 0], sizes = [8, 384], strides = [1, 1]} : vector<8x512xf32> to vector<8x384xf32>
    %cst_14 = arith.constant dense<0.000000e+00> : vector<16x384xf32>
    %18 = tpu.matmul %15, %17, %cst_14 {dimension_numbers = #tpu.dot_dimension_numbers<[1], [0], [0], [1], [0, 0, 1, 1], [], []>} : vector<16x8xf32>, vector<8x384xf32>, vector<16x384xf32> -> vector<16x384xf32>
    %19 = arith.addf %13, %18 : vector<16x384xf32>
    %c3 = arith.constant 3 : index
    %c0_15 = arith.constant 0 : index
    %c0_16 = arith.constant 0 : index
    %20 = vector.load %arg2[%c3, %c0_15, %c0_16] : memref<9x16x8xf32, #tpu.memory_space<vmem>>, vector<1x16x8xf32>
    %21 = vector.shape_cast %20 : vector<1x16x8xf32> to vector<16x8xf32>
    %c488_i32 = arith.constant 488 : i32
    %22 = tpu.dynamic_rotate %3 by %c488_i32 dim 1 : vector<8x512xf32>, i32 -> vector<8x512xf32>
    %23 = vector.extract_strided_slice %22 {offsets = [0, 0], sizes = [8, 384], strides = [1, 1]} : vector<8x512xf32> to vector<8x384xf32>
    %cst_17 = arith.constant dense<0.000000e+00> : vector<16x384xf32>
    %24 = tpu.matmul %21, %23, %cst_17 {dimension_numbers = #tpu.dot_dimension_numbers<[1], [0], [0], [1], [0, 0, 1, 1], [], []>} : vector<16x8xf32>, vector<8x384xf32>, vector<16x384xf32> -> vector<16x384xf32>
    %25 = arith.addf %19, %24 : vector<16x384xf32>
    %c4 = arith.constant 4 : index
    %c0_18 = arith.constant 0 : index
    %c0_19 = arith.constant 0 : index
    %26 = vector.load %arg2[%c4, %c0_18, %c0_19] : memref<9x16x8xf32, #tpu.memory_space<vmem>>, vector<1x16x8xf32>
    %27 = vector.shape_cast %26 : vector<1x16x8xf32> to vector<16x8xf32>
    %c487_i32 = arith.constant 487 : i32
    %28 = tpu.dynamic_rotate %3 by %c487_i32 dim 1 : vector<8x512xf32>, i32 -> vector<8x512xf32>
    %29 = vector.extract_strided_slice %28 {offsets = [0, 0], sizes = [8, 384], strides = [1, 1]} : vector<8x512xf32> to vector<8x384xf32>
    %cst_20 = arith.constant dense<0.000000e+00> : vector<16x384xf32>
    %30 = tpu.matmul %27, %29, %cst_20 {dimension_numbers = #tpu.dot_dimension_numbers<[1], [0], [0], [1], [0, 0, 1, 1], [], []>} : vector<16x8xf32>, vector<8x384xf32>, vector<16x384xf32> -> vector<16x384xf32>
    %31 = arith.addf %25, %30 : vector<16x384xf32>
    %c5 = arith.constant 5 : index
    %c0_21 = arith.constant 0 : index
    %c0_22 = arith.constant 0 : index
    %32 = vector.load %arg2[%c5, %c0_21, %c0_22] : memref<9x16x8xf32, #tpu.memory_space<vmem>>, vector<1x16x8xf32>
    %33 = vector.shape_cast %32 : vector<1x16x8xf32> to vector<16x8xf32>
    %c486_i32 = arith.constant 486 : i32
    %34 = tpu.dynamic_rotate %3 by %c486_i32 dim 1 : vector<8x512xf32>, i32 -> vector<8x512xf32>
    %35 = vector.extract_strided_slice %34 {offsets = [0, 0], sizes = [8, 384], strides = [1, 1]} : vector<8x512xf32> to vector<8x384xf32>
    %cst_23 = arith.constant dense<0.000000e+00> : vector<16x384xf32>
    %36 = tpu.matmul %33, %35, %cst_23 {dimension_numbers = #tpu.dot_dimension_numbers<[1], [0], [0], [1], [0, 0, 1, 1], [], []>} : vector<16x8xf32>, vector<8x384xf32>, vector<16x384xf32> -> vector<16x384xf32>
    %37 = arith.addf %31, %36 : vector<16x384xf32>
    %c6 = arith.constant 6 : index
    %c0_24 = arith.constant 0 : index
    %c0_25 = arith.constant 0 : index
    %38 = vector.load %arg2[%c6, %c0_24, %c0_25] : memref<9x16x8xf32, #tpu.memory_space<vmem>>, vector<1x16x8xf32>
    %39 = vector.shape_cast %38 : vector<1x16x8xf32> to vector<16x8xf32>
    %c464_i32 = arith.constant 464 : i32
    %40 = tpu.dynamic_rotate %3 by %c464_i32 dim 1 : vector<8x512xf32>, i32 -> vector<8x512xf32>
    %41 = vector.extract_strided_slice %40 {offsets = [0, 0], sizes = [8, 384], strides = [1, 1]} : vector<8x512xf32> to vector<8x384xf32>
    %cst_26 = arith.constant dense<0.000000e+00> : vector<16x384xf32>
    %42 = tpu.matmul %39, %41, %cst_26 {dimension_numbers = #tpu.dot_dimension_numbers<[1], [0], [0], [1], [0, 0, 1, 1], [], []>} : vector<16x8xf32>, vector<8x384xf32>, vector<16x384xf32> -> vector<16x384xf32>
    %43 = arith.addf %37, %42 : vector<16x384xf32>
    %c7 = arith.constant 7 : index
    %c0_27 = arith.constant 0 : index
    %c0_28 = arith.constant 0 : index
    %44 = vector.load %arg2[%c7, %c0_27, %c0_28] : memref<9x16x8xf32, #tpu.memory_space<vmem>>, vector<1x16x8xf32>
    %45 = vector.shape_cast %44 : vector<1x16x8xf32> to vector<16x8xf32>
    %c463_i32 = arith.constant 463 : i32
    %46 = tpu.dynamic_rotate %3 by %c463_i32 dim 1 : vector<8x512xf32>, i32 -> vector<8x512xf32>
    %47 = vector.extract_strided_slice %46 {offsets = [0, 0], sizes = [8, 384], strides = [1, 1]} : vector<8x512xf32> to vector<8x384xf32>
    %cst_29 = arith.constant dense<0.000000e+00> : vector<16x384xf32>
    %48 = tpu.matmul %45, %47, %cst_29 {dimension_numbers = #tpu.dot_dimension_numbers<[1], [0], [0], [1], [0, 0, 1, 1], [], []>} : vector<16x8xf32>, vector<8x384xf32>, vector<16x384xf32> -> vector<16x384xf32>
    %49 = arith.addf %43, %48 : vector<16x384xf32>
    %c8 = arith.constant 8 : index
    %c0_30 = arith.constant 0 : index
    %c0_31 = arith.constant 0 : index
    %50 = vector.load %arg2[%c8, %c0_30, %c0_31] : memref<9x16x8xf32, #tpu.memory_space<vmem>>, vector<1x16x8xf32>
    %51 = vector.shape_cast %50 : vector<1x16x8xf32> to vector<16x8xf32>
    %c462_i32 = arith.constant 462 : i32
    %52 = tpu.dynamic_rotate %3 by %c462_i32 dim 1 : vector<8x512xf32>, i32 -> vector<8x512xf32>
    %53 = vector.extract_strided_slice %52 {offsets = [0, 0], sizes = [8, 384], strides = [1, 1]} : vector<8x512xf32> to vector<8x384xf32>
    %cst_32 = arith.constant dense<0.000000e+00> : vector<16x384xf32>
    %54 = tpu.matmul %51, %53, %cst_32 {dimension_numbers = #tpu.dot_dimension_numbers<[1], [0], [0], [1], [0, 0, 1, 1], [], []>} : vector<16x8xf32>, vector<8x384xf32>, vector<16x384xf32> -> vector<16x384xf32>
    %55 = arith.addf %49, %54 : vector<16x384xf32>
    %c0_33 = arith.constant 0 : index
    %c0_34 = arith.constant 0 : index
    %56 = vector.load %arg3[%c0_33, %c0_34] : memref<16x1xf32, #tpu.memory_space<vmem>>, vector<16x1xf32>
    %57 = vector.broadcast %56 : vector<16x1xf32> to vector<16x384xf32>
    %58 = arith.addf %55, %57 : vector<16x384xf32>
    %59 = vector.broadcast %0 : vector<1x384xf32> to vector<16x384xf32>
    %60 = arith.mulf %58, %59 : vector<16x384xf32>
    %61 = tpu.concatenate %60, %2 in 1 : vector<16x384xf32>, vector<16x128xf32> -> vector<16x512xf32>
    %c25_i32 = arith.constant 25 : i32
    %62 = tpu.dynamic_rotate %61 by %c25_i32 dim 1 : vector<16x512xf32>, i32 -> vector<16x512xf32>
    %63 = vector.extract_strided_slice %62 {offsets = [0, 0], sizes = [16, 384], strides = [1, 1]} : vector<16x512xf32> to vector<16x384xf32>
    %cst_35 = arith.constant 6.250000e-02 : f32
    %64 = vector.broadcast %cst_35 : f32 to vector<16x384xf32>
    %65 = arith.mulf %64, %63 : vector<16x384xf32>
    %c24_i32 = arith.constant 24 : i32
    %66 = tpu.dynamic_rotate %61 by %c24_i32 dim 1 : vector<16x512xf32>, i32 -> vector<16x512xf32>
    %67 = vector.extract_strided_slice %66 {offsets = [0, 0], sizes = [16, 384], strides = [1, 1]} : vector<16x512xf32> to vector<16x384xf32>
    %cst_36 = arith.constant 1.250000e-01 : f32
    %68 = vector.broadcast %cst_36 : f32 to vector<16x384xf32>
    %69 = arith.mulf %68, %67 : vector<16x384xf32>
    %70 = arith.addf %65, %69 : vector<16x384xf32>
    %c23_i32 = arith.constant 23 : i32
    %71 = tpu.dynamic_rotate %61 by %c23_i32 dim 1 : vector<16x512xf32>, i32 -> vector<16x512xf32>
    %72 = vector.extract_strided_slice %71 {offsets = [0, 0], sizes = [16, 384], strides = [1, 1]} : vector<16x512xf32> to vector<16x384xf32>
    %cst_37 = arith.constant 6.250000e-02 : f32
    %73 = vector.broadcast %cst_37 : f32 to vector<16x384xf32>
    %74 = arith.mulf %73, %72 : vector<16x384xf32>
    %75 = arith.addf %70, %74 : vector<16x384xf32>
    %c1_i32 = arith.constant 1 : i32
    %76 = tpu.dynamic_rotate %61 by %c1_i32 dim 1 : vector<16x512xf32>, i32 -> vector<16x512xf32>
    %77 = vector.extract_strided_slice %76 {offsets = [0, 0], sizes = [16, 384], strides = [1, 1]} : vector<16x512xf32> to vector<16x384xf32>
    %cst_38 = arith.constant 1.250000e-01 : f32
    %78 = vector.broadcast %cst_38 : f32 to vector<16x384xf32>
    %79 = arith.mulf %78, %77 : vector<16x384xf32>
    %80 = arith.addf %75, %79 : vector<16x384xf32>
    %81 = vector.extract_strided_slice %61 {offsets = [0, 0], sizes = [16, 384], strides = [1, 1]} : vector<16x512xf32> to vector<16x384xf32>
    %cst_39 = arith.constant 2.500000e-01 : f32
    %82 = vector.broadcast %cst_39 : f32 to vector<16x384xf32>
    %83 = arith.mulf %82, %81 : vector<16x384xf32>
    %84 = arith.addf %80, %83 : vector<16x384xf32>
    %c511_i32_40 = arith.constant 511 : i32
    %85 = tpu.dynamic_rotate %61 by %c511_i32_40 dim 1 : vector<16x512xf32>, i32 -> vector<16x512xf32>
    %86 = vector.extract_strided_slice %85 {offsets = [0, 0], sizes = [16, 384], strides = [1, 1]} : vector<16x512xf32> to vector<16x384xf32>
    %cst_41 = arith.constant 1.250000e-01 : f32
    %87 = vector.broadcast %cst_41 : f32 to vector<16x384xf32>
    %88 = arith.mulf %87, %86 : vector<16x384xf32>
    %89 = arith.addf %84, %88 : vector<16x384xf32>
    %c489_i32 = arith.constant 489 : i32
    %90 = tpu.dynamic_rotate %61 by %c489_i32 dim 1 : vector<16x512xf32>, i32 -> vector<16x512xf32>
    %91 = vector.extract_strided_slice %90 {offsets = [0, 0], sizes = [16, 384], strides = [1, 1]} : vector<16x512xf32> to vector<16x384xf32>
    %cst_42 = arith.constant 6.250000e-02 : f32
    %92 = vector.broadcast %cst_42 : f32 to vector<16x384xf32>
    %93 = arith.mulf %92, %91 : vector<16x384xf32>
    %94 = arith.addf %89, %93 : vector<16x384xf32>
    %c488_i32_43 = arith.constant 488 : i32
    %95 = tpu.dynamic_rotate %61 by %c488_i32_43 dim 1 : vector<16x512xf32>, i32 -> vector<16x512xf32>
    %96 = vector.extract_strided_slice %95 {offsets = [0, 0], sizes = [16, 384], strides = [1, 1]} : vector<16x512xf32> to vector<16x384xf32>
    %cst_44 = arith.constant 1.250000e-01 : f32
    %97 = vector.broadcast %cst_44 : f32 to vector<16x384xf32>
    %98 = arith.mulf %97, %96 : vector<16x384xf32>
    %99 = arith.addf %94, %98 : vector<16x384xf32>
    %c487_i32_45 = arith.constant 487 : i32
    %100 = tpu.dynamic_rotate %61 by %c487_i32_45 dim 1 : vector<16x512xf32>, i32 -> vector<16x512xf32>
    %101 = vector.extract_strided_slice %100 {offsets = [0, 0], sizes = [16, 384], strides = [1, 1]} : vector<16x512xf32> to vector<16x384xf32>
    %cst_46 = arith.constant 6.250000e-02 : f32
    %102 = vector.broadcast %cst_46 : f32 to vector<16x384xf32>
    %103 = arith.mulf %102, %101 : vector<16x384xf32>
    %104 = arith.addf %99, %103 : vector<16x384xf32>
    %c0_47 = arith.constant 0 : index
    %c0_48 = arith.constant 0 : index
    %105 = vector.load %arg5[%c0_47, %c0_48] : memref<16x1xf32, #tpu.memory_space<vmem>>, vector<16x1xf32>
    %c0_49 = arith.constant 0 : index
    %c0_50 = arith.constant 0 : index
    %106 = vector.load %arg6[%c0_49, %c0_50] : memref<16x1xf32, #tpu.memory_space<vmem>>, vector<16x1xf32>
    %c0_51 = arith.constant 0 : index
    %c0_52 = arith.constant 0 : index
    %107 = vector.load %arg7[%c0_51, %c0_52] : memref<16x1xf32, #tpu.memory_space<vmem>>, vector<16x1xf32>
    %108 = vector.broadcast %105 : vector<16x1xf32> to vector<16x384xf32>
    %109 = arith.mulf %1, %108 : vector<16x384xf32>
    %110 = arith.addf %104, %109 : vector<16x384xf32>
    %111 = vector.broadcast %0 : vector<1x384xf32> to vector<16x384xf32>
    %112 = arith.mulf %110, %111 : vector<16x384xf32>
    %cst_53 = arith.constant dense<0.000000e+00> : vector<16xf32>
    %113 = vector.multi_reduction <add>, %112, %cst_53 [1] : vector<16x384xf32> to vector<16xf32>
    %114 = vector.shape_cast %113 : vector<16xf32> to vector<16x1xf32>
    %cst_54 = arith.constant 3.906250e-03 : f32
    %115 = vector.broadcast %cst_54 : f32 to vector<16x1xf32>
    %116 = arith.mulf %114, %115 : vector<16x1xf32>
    %117 = vector.broadcast %116 : vector<16x1xf32> to vector<16x384xf32>
    %118 = arith.subf %110, %117 : vector<16x384xf32>
    %119 = arith.mulf %118, %118 : vector<16x384xf32>
    %120 = vector.broadcast %0 : vector<1x384xf32> to vector<16x384xf32>
    %121 = arith.mulf %119, %120 : vector<16x384xf32>
    %cst_55 = arith.constant dense<0.000000e+00> : vector<16xf32>
    %122 = vector.multi_reduction <add>, %121, %cst_55 [1] : vector<16x384xf32> to vector<16xf32>
    %123 = vector.shape_cast %122 : vector<16xf32> to vector<16x1xf32>
    %cst_56 = arith.constant 3.906250e-03 : f32
    %124 = vector.broadcast %cst_56 : f32 to vector<16x1xf32>
    %125 = arith.mulf %123, %124 : vector<16x1xf32>
    %cst_57 = arith.constant 9.99999974E-6 : f32
    %126 = vector.broadcast %cst_57 : f32 to vector<16x1xf32>
    %127 = arith.addf %125, %126 : vector<16x1xf32>
    %128 = math.rsqrt %127 : vector<16x1xf32>
    %129 = vector.broadcast %128 : vector<16x1xf32> to vector<16x384xf32>
    %130 = arith.mulf %118, %129 : vector<16x384xf32>
    %131 = vector.broadcast %106 : vector<16x1xf32> to vector<16x384xf32>
    %132 = arith.mulf %131, %130 : vector<16x384xf32>
    %133 = vector.broadcast %107 : vector<16x1xf32> to vector<16x384xf32>
    %134 = arith.addf %132, %133 : vector<16x384xf32>
    %cst_58 = arith.constant 2.000000e-01 : f32
    %135 = vector.broadcast %cst_58 : f32 to vector<16x384xf32>
    %136 = arith.mulf %135, %134 : vector<16x384xf32>
    %137 = arith.maximumf %134, %136 : vector<16x384xf32>
    %138 = vector.broadcast %0 : vector<1x384xf32> to vector<16x384xf32>
    %139 = arith.mulf %137, %138 : vector<16x384xf32>
    %140 = tpu.concatenate %139, %2 in 1 : vector<16x384xf32>, vector<16x128xf32> -> vector<16x512xf32>
    %c0_59 = arith.constant 0 : index
    %c0_60 = arith.constant 0 : index
    %c0_61 = arith.constant 0 : index
    %141 = vector.load %arg8[%c0_59, %c0_60, %c0_61] : memref<9x16x16xf32, #tpu.memory_space<vmem>>, vector<1x16x16xf32>
    %142 = vector.shape_cast %141 : vector<1x16x16xf32> to vector<16x16xf32>
    %c25_i32_62 = arith.constant 25 : i32
    %143 = tpu.dynamic_rotate %140 by %c25_i32_62 dim 1 : vector<16x512xf32>, i32 -> vector<16x512xf32>
    %144 = vector.extract_strided_slice %143 {offsets = [0, 0], sizes = [16, 384], strides = [1, 1]} : vector<16x512xf32> to vector<16x384xf32>
    %cst_63 = arith.constant dense<0.000000e+00> : vector<16x384xf32>
    %145 = tpu.matmul %142, %144, %cst_63 {dimension_numbers = #tpu.dot_dimension_numbers<[1], [0], [0], [1], [0, 0, 1, 1], [], []>} : vector<16x16xf32>, vector<16x384xf32>, vector<16x384xf32> -> vector<16x384xf32>
    %c1_64 = arith.constant 1 : index
    %c0_65 = arith.constant 0 : index
    %c0_66 = arith.constant 0 : index
    %146 = vector.load %arg8[%c1_64, %c0_65, %c0_66] : memref<9x16x16xf32, #tpu.memory_space<vmem>>, vector<1x16x16xf32>
    %147 = vector.shape_cast %146 : vector<1x16x16xf32> to vector<16x16xf32>
    %c24_i32_67 = arith.constant 24 : i32
    %148 = tpu.dynamic_rotate %140 by %c24_i32_67 dim 1 : vector<16x512xf32>, i32 -> vector<16x512xf32>
    %149 = vector.extract_strided_slice %148 {offsets = [0, 0], sizes = [16, 384], strides = [1, 1]} : vector<16x512xf32> to vector<16x384xf32>
    %cst_68 = arith.constant dense<0.000000e+00> : vector<16x384xf32>
    %150 = tpu.matmul %147, %149, %cst_68 {dimension_numbers = #tpu.dot_dimension_numbers<[1], [0], [0], [1], [0, 0, 1, 1], [], []>} : vector<16x16xf32>, vector<16x384xf32>, vector<16x384xf32> -> vector<16x384xf32>
    %151 = arith.addf %145, %150 : vector<16x384xf32>
    %c2_69 = arith.constant 2 : index
    %c0_70 = arith.constant 0 : index
    %c0_71 = arith.constant 0 : index
    %152 = vector.load %arg8[%c2_69, %c0_70, %c0_71] : memref<9x16x16xf32, #tpu.memory_space<vmem>>, vector<1x16x16xf32>
    %153 = vector.shape_cast %152 : vector<1x16x16xf32> to vector<16x16xf32>
    %c23_i32_72 = arith.constant 23 : i32
    %154 = tpu.dynamic_rotate %140 by %c23_i32_72 dim 1 : vector<16x512xf32>, i32 -> vector<16x512xf32>
    %155 = vector.extract_strided_slice %154 {offsets = [0, 0], sizes = [16, 384], strides = [1, 1]} : vector<16x512xf32> to vector<16x384xf32>
    %cst_73 = arith.constant dense<0.000000e+00> : vector<16x384xf32>
    %156 = tpu.matmul %153, %155, %cst_73 {dimension_numbers = #tpu.dot_dimension_numbers<[1], [0], [0], [1], [0, 0, 1, 1], [], []>} : vector<16x16xf32>, vector<16x384xf32>, vector<16x384xf32> -> vector<16x384xf32>
    %157 = arith.addf %151, %156 : vector<16x384xf32>
    %c3_74 = arith.constant 3 : index
    %c0_75 = arith.constant 0 : index
    %c0_76 = arith.constant 0 : index
    %158 = vector.load %arg8[%c3_74, %c0_75, %c0_76] : memref<9x16x16xf32, #tpu.memory_space<vmem>>, vector<1x16x16xf32>
    %159 = vector.shape_cast %158 : vector<1x16x16xf32> to vector<16x16xf32>
    %c1_i32_77 = arith.constant 1 : i32
    %160 = tpu.dynamic_rotate %140 by %c1_i32_77 dim 1 : vector<16x512xf32>, i32 -> vector<16x512xf32>
    %161 = vector.extract_strided_slice %160 {offsets = [0, 0], sizes = [16, 384], strides = [1, 1]} : vector<16x512xf32> to vector<16x384xf32>
    %cst_78 = arith.constant dense<0.000000e+00> : vector<16x384xf32>
    %162 = tpu.matmul %159, %161, %cst_78 {dimension_numbers = #tpu.dot_dimension_numbers<[1], [0], [0], [1], [0, 0, 1, 1], [], []>} : vector<16x16xf32>, vector<16x384xf32>, vector<16x384xf32> -> vector<16x384xf32>
    %163 = arith.addf %157, %162 : vector<16x384xf32>
    %c4_79 = arith.constant 4 : index
    %c0_80 = arith.constant 0 : index
    %c0_81 = arith.constant 0 : index
    %164 = vector.load %arg8[%c4_79, %c0_80, %c0_81] : memref<9x16x16xf32, #tpu.memory_space<vmem>>, vector<1x16x16xf32>
    %165 = vector.shape_cast %164 : vector<1x16x16xf32> to vector<16x16xf32>
    %166 = vector.extract_strided_slice %140 {offsets = [0, 0], sizes = [16, 384], strides = [1, 1]} : vector<16x512xf32> to vector<16x384xf32>
    %cst_82 = arith.constant dense<0.000000e+00> : vector<16x384xf32>
    %167 = tpu.matmul %165, %166, %cst_82 {dimension_numbers = #tpu.dot_dimension_numbers<[1], [0], [0], [1], [0, 0, 1, 1], [], []>} : vector<16x16xf32>, vector<16x384xf32>, vector<16x384xf32> -> vector<16x384xf32>
    %168 = arith.addf %163, %167 : vector<16x384xf32>
    %c5_83 = arith.constant 5 : index
    %c0_84 = arith.constant 0 : index
    %c0_85 = arith.constant 0 : index
    %169 = vector.load %arg8[%c5_83, %c0_84, %c0_85] : memref<9x16x16xf32, #tpu.memory_space<vmem>>, vector<1x16x16xf32>
    %170 = vector.shape_cast %169 : vector<1x16x16xf32> to vector<16x16xf32>
    %c511_i32_86 = arith.constant 511 : i32
    %171 = tpu.dynamic_rotate %140 by %c511_i32_86 dim 1 : vector<16x512xf32>, i32 -> vector<16x512xf32>
    %172 = vector.extract_strided_slice %171 {offsets = [0, 0], sizes = [16, 384], strides = [1, 1]} : vector<16x512xf32> to vector<16x384xf32>
    %cst_87 = arith.constant dense<0.000000e+00> : vector<16x384xf32>
    %173 = tpu.matmul %170, %172, %cst_87 {dimension_numbers = #tpu.dot_dimension_numbers<[1], [0], [0], [1], [0, 0, 1, 1], [], []>} : vector<16x16xf32>, vector<16x384xf32>, vector<16x384xf32> -> vector<16x384xf32>
    %174 = arith.addf %168, %173 : vector<16x384xf32>
    %c6_88 = arith.constant 6 : index
    %c0_89 = arith.constant 0 : index
    %c0_90 = arith.constant 0 : index
    %175 = vector.load %arg8[%c6_88, %c0_89, %c0_90] : memref<9x16x16xf32, #tpu.memory_space<vmem>>, vector<1x16x16xf32>
    %176 = vector.shape_cast %175 : vector<1x16x16xf32> to vector<16x16xf32>
    %c489_i32_91 = arith.constant 489 : i32
    %177 = tpu.dynamic_rotate %140 by %c489_i32_91 dim 1 : vector<16x512xf32>, i32 -> vector<16x512xf32>
    %178 = vector.extract_strided_slice %177 {offsets = [0, 0], sizes = [16, 384], strides = [1, 1]} : vector<16x512xf32> to vector<16x384xf32>
    %cst_92 = arith.constant dense<0.000000e+00> : vector<16x384xf32>
    %179 = tpu.matmul %176, %178, %cst_92 {dimension_numbers = #tpu.dot_dimension_numbers<[1], [0], [0], [1], [0, 0, 1, 1], [], []>} : vector<16x16xf32>, vector<16x384xf32>, vector<16x384xf32> -> vector<16x384xf32>
    %180 = arith.addf %174, %179 : vector<16x384xf32>
    %c7_93 = arith.constant 7 : index
    %c0_94 = arith.constant 0 : index
    %c0_95 = arith.constant 0 : index
    %181 = vector.load %arg8[%c7_93, %c0_94, %c0_95] : memref<9x16x16xf32, #tpu.memory_space<vmem>>, vector<1x16x16xf32>
    %182 = vector.shape_cast %181 : vector<1x16x16xf32> to vector<16x16xf32>
    %c488_i32_96 = arith.constant 488 : i32
    %183 = tpu.dynamic_rotate %140 by %c488_i32_96 dim 1 : vector<16x512xf32>, i32 -> vector<16x512xf32>
    %184 = vector.extract_strided_slice %183 {offsets = [0, 0], sizes = [16, 384], strides = [1, 1]} : vector<16x512xf32> to vector<16x384xf32>
    %cst_97 = arith.constant dense<0.000000e+00> : vector<16x384xf32>
    %185 = tpu.matmul %182, %184, %cst_97 {dimension_numbers = #tpu.dot_dimension_numbers<[1], [0], [0], [1], [0, 0, 1, 1], [], []>} : vector<16x16xf32>, vector<16x384xf32>, vector<16x384xf32> -> vector<16x384xf32>
    %186 = arith.addf %180, %185 : vector<16x384xf32>
    %c8_98 = arith.constant 8 : index
    %c0_99 = arith.constant 0 : index
    %c0_100 = arith.constant 0 : index
    %187 = vector.load %arg8[%c8_98, %c0_99, %c0_100] : memref<9x16x16xf32, #tpu.memory_space<vmem>>, vector<1x16x16xf32>
    %188 = vector.shape_cast %187 : vector<1x16x16xf32> to vector<16x16xf32>
    %c487_i32_101 = arith.constant 487 : i32
    %189 = tpu.dynamic_rotate %140 by %c487_i32_101 dim 1 : vector<16x512xf32>, i32 -> vector<16x512xf32>
    %190 = vector.extract_strided_slice %189 {offsets = [0, 0], sizes = [16, 384], strides = [1, 1]} : vector<16x512xf32> to vector<16x384xf32>
    %cst_102 = arith.constant dense<0.000000e+00> : vector<16x384xf32>
    %191 = tpu.matmul %188, %190, %cst_102 {dimension_numbers = #tpu.dot_dimension_numbers<[1], [0], [0], [1], [0, 0, 1, 1], [], []>} : vector<16x16xf32>, vector<16x384xf32>, vector<16x384xf32> -> vector<16x384xf32>
    %192 = arith.addf %186, %191 : vector<16x384xf32>
    %c0_103 = arith.constant 0 : index
    %c0_104 = arith.constant 0 : index
    %193 = vector.load %arg9[%c0_103, %c0_104] : memref<16x1xf32, #tpu.memory_space<vmem>>, vector<16x1xf32>
    %194 = vector.broadcast %193 : vector<16x1xf32> to vector<16x384xf32>
    %195 = arith.addf %192, %194 : vector<16x384xf32>
    %c0_105 = arith.constant 0 : index
    %c0_106 = arith.constant 0 : index
    %196 = vector.load %arg10[%c0_105, %c0_106] : memref<16x1xf32, #tpu.memory_space<vmem>>, vector<16x1xf32>
    %c0_107 = arith.constant 0 : index
    %c0_108 = arith.constant 0 : index
    %197 = vector.load %arg11[%c0_107, %c0_108] : memref<16x1xf32, #tpu.memory_space<vmem>>, vector<16x1xf32>
    %c0_109 = arith.constant 0 : index
    %c0_110 = arith.constant 0 : index
    %198 = vector.load %arg12[%c0_109, %c0_110] : memref<16x1xf32, #tpu.memory_space<vmem>>, vector<16x1xf32>
    %199 = vector.broadcast %196 : vector<16x1xf32> to vector<16x384xf32>
    %200 = arith.mulf %1, %199 : vector<16x384xf32>
    %201 = arith.addf %195, %200 : vector<16x384xf32>
    %202 = vector.broadcast %0 : vector<1x384xf32> to vector<16x384xf32>
    %203 = arith.mulf %201, %202 : vector<16x384xf32>
    %cst_111 = arith.constant dense<0.000000e+00> : vector<16xf32>
    %204 = vector.multi_reduction <add>, %203, %cst_111 [1] : vector<16x384xf32> to vector<16xf32>
    %205 = vector.shape_cast %204 : vector<16xf32> to vector<16x1xf32>
    %cst_112 = arith.constant 3.906250e-03 : f32
    %206 = vector.broadcast %cst_112 : f32 to vector<16x1xf32>
    %207 = arith.mulf %205, %206 : vector<16x1xf32>
    %208 = vector.broadcast %207 : vector<16x1xf32> to vector<16x384xf32>
    %209 = arith.subf %201, %208 : vector<16x384xf32>
    %210 = arith.mulf %209, %209 : vector<16x384xf32>
    %211 = vector.broadcast %0 : vector<1x384xf32> to vector<16x384xf32>
    %212 = arith.mulf %210, %211 : vector<16x384xf32>
    %cst_113 = arith.constant dense<0.000000e+00> : vector<16xf32>
    %213 = vector.multi_reduction <add>, %212, %cst_113 [1] : vector<16x384xf32> to vector<16xf32>
    %214 = vector.shape_cast %213 : vector<16xf32> to vector<16x1xf32>
    %cst_114 = arith.constant 3.906250e-03 : f32
    %215 = vector.broadcast %cst_114 : f32 to vector<16x1xf32>
    %216 = arith.mulf %214, %215 : vector<16x1xf32>
    %cst_115 = arith.constant 9.99999974E-6 : f32
    %217 = vector.broadcast %cst_115 : f32 to vector<16x1xf32>
    %218 = arith.addf %216, %217 : vector<16x1xf32>
    %219 = math.rsqrt %218 : vector<16x1xf32>
    %220 = vector.broadcast %219 : vector<16x1xf32> to vector<16x384xf32>
    %221 = arith.mulf %209, %220 : vector<16x384xf32>
    %222 = vector.broadcast %197 : vector<16x1xf32> to vector<16x384xf32>
    %223 = arith.mulf %222, %221 : vector<16x384xf32>
    %224 = vector.broadcast %198 : vector<16x1xf32> to vector<16x384xf32>
    %225 = arith.addf %223, %224 : vector<16x384xf32>
    %cst_116 = arith.constant 2.000000e-01 : f32
    %226 = vector.broadcast %cst_116 : f32 to vector<16x384xf32>
    %227 = arith.mulf %226, %225 : vector<16x384xf32>
    %228 = arith.maximumf %225, %227 : vector<16x384xf32>
    %c0_117 = arith.constant 0 : index
    %c0_118 = arith.constant 0 : index
    %229 = vector.load %arg14[%c0_117, %c0_118] : memref<16x384xf32, #tpu.memory_space<vmem>>, vector<16x384xf32>
    tpu.vector_store %arg14[%c0_117, %c0_118], %228 {strides = array<i32>} : memref<16x384xf32, #tpu.memory_space<vmem>>, vector<16x384xf32>,
    return
  }
  func.func @transform_0(%arg0: i32) -> (i32, i32) {
    %c0_i32 = arith.constant 0 : i32
    %c0_i32_0 = arith.constant 0 : i32
    return %arg0, %c0_i32 : i32, i32
  }
  func.func @transform_1(%arg0: i32) -> (i32, i32, i32) {
    %c0_i32 = arith.constant 0 : i32
    %c0_i32_0 = arith.constant 0 : i32
    %c0_i32_1 = arith.constant 0 : i32
    %c0_i32_2 = arith.constant 0 : i32
    return %c0_i32, %c0_i32_0, %c0_i32_1 : i32, i32, i32
  }
  func.func @transform_2(%arg0: i32) -> (i32, i32) {
    %c0_i32 = arith.constant 0 : i32
    %c0_i32_0 = arith.constant 0 : i32
    %c0_i32_1 = arith.constant 0 : i32
    return %c0_i32, %c0_i32_0 : i32, i32
  }
  func.func @transform_3(%arg0: i32) -> (i32, i32) {
    %c0_i32 = arith.constant 0 : i32
    %c0_i32_0 = arith.constant 0 : i32
    return %arg0, %c0_i32 : i32, i32
  }
  func.func @transform_4(%arg0: i32) -> (i32, i32) {
    %c0_i32 = arith.constant 0 : i32
    %c0_i32_0 = arith.constant 0 : i32
    %c0_i32_1 = arith.constant 0 : i32
    return %c0_i32, %c0_i32_0 : i32, i32
  }
  func.func @transform_5(%arg0: i32) -> (i32, i32) {
    %c0_i32 = arith.constant 0 : i32
    %c0_i32_0 = arith.constant 0 : i32
    return %arg0, %c0_i32 : i32, i32
  }
  func.func @transform_6(%arg0: i32) -> (i32, i32) {
    %c0_i32 = arith.constant 0 : i32
    %c0_i32_0 = arith.constant 0 : i32
    return %arg0, %c0_i32 : i32, i32
  }
  func.func @transform_7(%arg0: i32) -> (i32, i32, i32) {
    %c0_i32 = arith.constant 0 : i32
    %c0_i32_0 = arith.constant 0 : i32
    %c0_i32_1 = arith.constant 0 : i32
    %c0_i32_2 = arith.constant 0 : i32
    return %c0_i32, %c0_i32_0, %c0_i32_1 : i32, i32, i32
  }
  func.func @transform_8(%arg0: i32) -> (i32, i32) {
    %c0_i32 = arith.constant 0 : i32
    %c0_i32_0 = arith.constant 0 : i32
    %c0_i32_1 = arith.constant 0 : i32
    return %c0_i32, %c0_i32_0 : i32, i32
  }
  func.func @transform_9(%arg0: i32) -> (i32, i32) {
    %c0_i32 = arith.constant 0 : i32
    %c0_i32_0 = arith.constant 0 : i32
    %c0_i32_1 = arith.constant 0 : i32
    return %c0_i32, %c0_i32_0 : i32, i32
  }
  func.func @transform_10(%arg0: i32) -> (i32, i32) {
    %c0_i32 = arith.constant 0 : i32
    %c0_i32_0 = arith.constant 0 : i32
    return %arg0, %c0_i32 : i32, i32
  }
  func.func @transform_11(%arg0: i32) -> (i32, i32) {
    %c0_i32 = arith.constant 0 : i32
    %c0_i32_0 = arith.constant 0 : i32
    return %arg0, %c0_i32 : i32, i32
  }
  func.func @transform_12(%arg0: i32) -> (i32, i32) {
    %c0_i32 = arith.constant 0 : i32
    %c0_i32_0 = arith.constant 0 : i32
    %c0_i32_1 = arith.constant 0 : i32
    return %c0_i32, %c0_i32_0 : i32, i32
  }
  func.func @transform_13(%arg0: i32) -> (i32, i32) {
    %c0_i32 = arith.constant 0 : i32
    %c0_i32_0 = arith.constant 0 : i32
    return %arg0, %c0_i32 : i32, i32
  }
}

</mosaic_0001>

<bundles_post_ra>
// kernel: tpu_custom_call.1
= control target key start
LH: loop header
LB: loop body
LE: loop exit
PB: predicated region body
PF: predicated region fallthrough
CT: control target
= control target key end

     0   :  { %s6488_s0 = inlined_call_operand.vmem [shape: f32[16,512], index: 0, kind: input, shape index: {}]   ;;  %s6489_s1 = inlined_call_operand.vmem [shape: f32[9,16,8], index: 1, kind: input, shape index: {}]   ;;  %s6490_s2 = inlined_call_operand.vmem [shape: f32[16,1], index: 2, kind: input, shape index: {}]   ;;  %s6491_s3 = inlined_call_operand.vmem [shape: f32[32,384], index: 3, kind: input, shape index: {}]   ;;  %s6492_s4 = inlined_call_operand.vmem [shape: f32[16,1], index: 4, kind: input, shape index: {}]   ;;  %s6493_s5 = inlined_call_operand.vmem [shape: f32[32,1], index: 5, kind: input, shape index: {}]   ;;  %s6494_s6 = inlined_call_operand.vmem [shape: f32[32,1], index: 6, kind: input, shape index: {}]   ;;  %s6495_s7 = inlined_call_operand.vmem [shape: f32[9,16,16], index: 7, kind: input, shape index: {}]   ;;  %s6496_s8 = inlined_call_operand.vmem [shape: f32[16,1], index: 8, kind: input, shape index: {}]   ;;  %s6497_s9 = inlined_call_operand.vmem [shape: f32[16,1], index: 9, kind: input, shape index: {}]   ;;  %s6498_s10 = inlined_call_operand.vmem [shape: f32[32,1], index: 10, kind: input, shape index: {}]   ;;  %s6499_s11 = inlined_call_operand.vmem [shape: f32[32,1], index: 11, kind: input, shape index: {}]   ;;  %s6500_s12 = inlined_call_operand.vmem [shape: f32[1,384], index: 12, kind: input, shape index: {}]   ;;  %s6501_s13 = inlined_call_operand.hbm [shape: f32[32,384], index: 13, kind: output, shape index: {}]  }
   0x1   :  { %6518 = sst [smem:[#allocation5_spill]] %s6488_s0 }
   0x2   :  { %6519 = sst [smem:[#allocation6_spill]] %s6489_s1 }
   0x3   :  { %6520 = sst [smem:[#allocation7_spill]] %s6490_s2 }
   0x4   :  { %6521 = sst [smem:[#allocation8_spill]] %s6491_s3 }
   0x5   :  { %18 = vsyncpa [#allocation3], 0 }
   0x6   :  { %20 = vsyncpa [#allocation3 + $0x1], 0  ;;  %s5320_s25 = smov 0   ;;  %s5322_s26 = smov 0  }
   0x7   :  { %s5324_s27 = smov 0   ;;  %s5326_s28 = smov 0  }
   0x8 LB: > { %s5341_s29 = sadd.s32 4294967295, %s5231_s28   ;;  %s4514_s30 = sadd.s32 4294967294, %s5231_s28   ;;  %s5231_s28 = sphi %s5326_s28, %s6539_s28   ;;  %s5227_s27 = sphi %s5324_s27, %s6538_s27   ;;  %s5223_s26 = sphi %s5322_s26, %s6537_s26   ;;  %s5219_s25 = sphi %s5320_s25, %s6536_s25  }
   0x9   : > { %s5345_s14 = sadd.s32 1, %s5231_s28   ;;  %s336_s15 = sadd.s32 1, %s5227_s27 }
   0xa   : > { %s333_s16 = ssub.s32 %s5231_s28, %s5345_s14  ;;  %p346_p0 = scmp.ne.s32.totalorder %s5227_s27, %s5223_s26 }
   0xb   : > { %p334_p1 = scmp.eq.s32.totalorder %s333_s16, 0  ;;  %p347_p2 = scmp.eq.s32.totalorder %s5341_s29, 1 }
   0xc   : > { %p352_p3 = scmp.ne.s32.totalorder %s5223_s26, %s5219_s25  ;;  %p353_p4 = scmp.eq.s32.totalorder %s4514_s30, 1 }
   0xd   : > { %s5356_s17 = scalar_select %p334_p1, %s5227_s27, %s336_s15  }
   0xe   : > { %p5358_p5 = por %p347_p2, %p346_p0  ;;  %p5362_p6 = por %p353_p4, %p352_p3 }
   0xf   : > { %p4517_p7 = scmp.ge.s32.totalorder %s5231_s28, 1  ;;  %p446_p8 = scmp.lt.s32.totalorder %s5231_s28, 3 }
  0x11   : > { %p447_p9 = pnand %p4517_p7, %p446_p8 }
  0x12   : > { %p516_p10 = scmp.lt.s32.totalorder (!%p447_p9), %s5341_s29, 1  ;;  %s6524_s1 = sld [smem:[#allocation6_spill]] (!%p447_p9)  ;;  %vm583_vm0 = vcmask (!%p447_p9), 64512   ;;  %v5233_v1 = vmov (!%p447_p9), 0.0   ;;  %v5242_v10 = vmov (!%p447_p9), 0   ;;  %v2460_v11 = vld [vmem:[%s6492_s4] sm:$0xff] (!%p447_p9)  ;;  %v577_v13 = vlaneseq (!%p447_p9) }
  0x13   : > { %450 = sbr.rel (%p447_p9) target bundleno = 1742 (0x6ce), region = 72  ;;  %654 = vmatprep.mubr.f32.mxu0 (!%p447_p9), %v5233_v1  ;;  %s6525_s0 = sld [smem:[#allocation5_spill]] (!%p447_p9)  ;;  %5038 = vset.pattern.permute.xlu1 (!%p447_p9), %v5242_v10  ;;  %v2461_v12 = vld [vmem:[%s6492_s4 + $0x8] sm:$0xff] (!%p447_p9)  ;;  %vm2633_vm14 = vcmask (!%p447_p9), 130048  }
  0x14   : > { %s6512_s16 = smov (!%p447_p9), 127   ;;  %s5235_s24 = smov (!%p447_p9), 126   ;;  %5037 = vset.pattern.permute.xlu0 (!%p447_p9), %v5242_v10  ;;  %v5452_v14 = vand.u32 (!%p447_p9), 127, %v577_v13 }
  0x15   : > { %s6504_s30 = smov (!%p447_p9), 104   ;;  %s5238_s20 = smov (!%p447_p9), 102  }
  0x16   : > { %s5239_s21 = smov (!%p447_p9), 80   ;;  %s6526_s2 = sld [smem:[#allocation7_spill]] (!%p447_p9)  ;;  %vm579_vm1 = vcmp.lt.s32.totalorder (!%p447_p9), %v5452_v14, 127  ;;  %vm911_vm2 = vcmp.lt.s32.totalorder (!%p447_p9), %v5452_v14, 126  ;;  %vm1090_vm3 = vcmp.lt.s32.totalorder (!%p447_p9), %v5452_v14, 104  ;;  %vm1269_vm4 = vcmp.lt.s32.totalorder (!%p447_p9), %v5452_v14, 103 }
  0x17   : > { %vm1448_vm5 = vcmp.lt.s32.totalorder (!%p447_p9), %v5452_v14, 102  ;;  %vm1627_vm6 = vcmp.lt.s32.totalorder (!%p447_p9), %v5452_v14, 80  ;;  %vm1806_vm7 = vcmp.lt.s32.totalorder (!%p447_p9), %v5452_v14, 79  ;;  %vm1985_vm8 = vcmp.lt.s32.totalorder (!%p447_p9), %v5452_v14, 78  ;;  %s6531_s3 = sld [smem:[#allocation8_spill]] (!%p447_p9) }
  0x18   : > { %v5372_v0 = vld [vmem:[%s6524_s1] sm:$0xff] (!%p447_p9)  ;;  %v5392_v5 = vld [vmem:[%s6524_s1 + $0x8] sm:$0xff] (!%p447_p9)  ;;  %v4530_v20 = vld [vmem:[%s6524_s1 + $0x10] sm:$0xff] (!%p447_p9)  ;;  %vm2234_vm9 = vcmp.lt.s32.totalorder (!%p447_p9), %v5452_v14, 24  ;;  %vm2207_vm10 = vcmp.lt.s32.totalorder (!%p447_p9), %v5452_v14, 25  ;;  %vm2300_vm11 = vcmp.lt.s32.totalorder (!%p447_p9), %v5452_v14, 1 }
  0x19   : > { %4710 = vmatprep.mubr.msk.f32.mxu1 (!%p447_p9), %vm583_vm0, %v5372_v0  ;;  %v5397_v7 = vld [vmem:[%s6524_s1 + $0x20] sm:$0xff] (!%p447_p9)  ;;  %v4531_v25 = vld [vmem:[%s6524_s1 + $0x18] sm:$0xff] (!%p447_p9)  ;;  %v4541_v29 = vld [vmem:[%s6524_s1 + $0x28] sm:$0xff] (!%p447_p9)  ;;  %vm2267_vm12 = vcmp.lt.s32.totalorder (!%p447_p9), %v5452_v14, 23  ;;  %vm2377_vm13 = vcmp.lt.s32.totalorder (!%p447_p9), %v5452_v14, 105 }
  0x1a   : > { %s517_s22 = scalar_select %p516_p10, %s5341_s29, 1  ;;  %v4546_v30 = vld [vmem:[%s6524_s1 + $0x30] sm:$0xff]  ;;  %v4547_v39 = vld [vmem:[%s6524_s1 + $0x38] sm:$0xff]  ;;  %v4552_v40 = vld [vmem:[%s6524_s1 + $0x40] sm:$0xff] }
  0x1b   : > { %v4553_v48 = vld [vmem:[%s6524_s1 + $0x48] sm:$0xff]  ;;  %v4558_v49 = vld [vmem:[%s6524_s1 + $0x50] sm:$0xff]  ;;  %v4559_v57 = vld [vmem:[%s6524_s1 + $0x58] sm:$0xff] }
  0x1c   : > { %s4639_s23 = sshll.u32 %s517_s22, 5  ;;  %s5240_s22 = smov 79   ;;  %v2154_v8 = vld [vmem:[%s6526_s2 + $0x8] sm:$0xff]  ;;  %v2153_v9 = vld [vmem:[%s6526_s2] sm:$0xff] }
  0x1d   : > { %s520_s15 = scalar_lea.vmem %s6525_s0, %s4639_s23  ;;  %s5241_s23 = smov 78   ;;  %v4564_v58 = vld [vmem:[%s6524_s1 + $0x60] sm:$0xff]  ;;  %v4629_v14 = vld [vmem:[%s6495_s7 + $0x88] sm:$0xff] }
  0x1e   : > { %v5381_v2 = vld [vmem:[%s520_s15 + $0x8] sm:$0xff]  ;;  %v5383_v3 = vld [vmem:[%s520_s15] sm:$0xff]  ;;  %v562_v4 = vld [vmem:[%s520_s15 + $0x10] sm:$0xff] }
  0x1f   : > { %571 = vrot.lane.b32.xlu0 %v5381_v2, %s6512_s16  ;;  %569 = vrot.lane.b32.xlu1 %v5383_v3, %s6512_s16  ;;  %v563_v6 = vld [vmem:[%s520_s15 + $0x18] sm:$0xff]  ;;  %s6502_s15 = smov 103  }
  0x20   : > { %4708 = vmatprep.subr.mxu1 %v562_v4 }
  0x21   : > { %4709 = vmatpush3.msra.mxu1 %v562_v4 }
  0x22   : > { %4711 = vmatmul.mubr.msk.f32.vlgmr.msra.gmra.mrb[0].mxu1 %vm583_vm0, %v5392_v5 }
  0x23   : > { %573 = vrot.lane.b32.xlu0 %v562_v4, %s6512_s16  ;;  %575 = vrot.lane.b32.xlu1 %v563_v6, %s6512_s16 }
  0x24   : > { %4715 = vmatprep.mubr.msk.f32.mxu1 %vm583_vm0, %v5397_v7 }
  0x27   : > { %905 = vrot.lane.b32.xlu0 %v5381_v2, %s5235_s24  ;;  %907 = vrot.lane.b32.xlu1 %v562_v4, %s5235_s24 }
  0x2b   : > { %903 = vrot.lane.b32.xlu0 %v5383_v3, %s5235_s24  ;;  %909 = vrot.lane.b32.xlu1 %v563_v6, %s5235_s24  ;;  %s6514_s24 = smov 1  }
  0x2f   : > { %1084 = vrot.lane.b32.xlu0 %v5381_v2, %s6504_s30  ;;  %1086 = vrot.lane.b32.xlu1 %v562_v4, %s6504_s30 }
  0x33   : > { %1082 = vrot.lane.b32.xlu0 %v5383_v3, %s6504_s30  ;;  %1088 = vrot.lane.b32.xlu1 %v563_v6, %s6504_s30  ;;  %s6508_s30 = smov 24  }
  0x37   : > { %1263 = vrot.lane.b32.xlu0 %v5381_v2, %s6502_s15  ;;  %1265 = vrot.lane.b32.xlu1 %v562_v4, %s6502_s15 }
  0x3b   : > { %1261 = vrot.lane.b32.xlu0 %v5383_v3, %s6502_s15  ;;  %1267 = vrot.lane.b32.xlu1 %v563_v6, %s6502_s15  ;;  %s6530_s15 = smov 103  }
  0x3f   : > { %1442 = vrot.lane.b32.xlu0 %v5381_v2, %s5238_s20  ;;  %1444 = vrot.lane.b32.xlu1 %v562_v4, %s5238_s20 }
  0x43   : > { %1440 = vrot.lane.b32.xlu0 %v5383_v3, %s5238_s20  ;;  %1446 = vrot.lane.b32.xlu1 %v563_v6, %s5238_s20  ;;  %s6510_s20 = smov 105  }
  0x47   : > { %1621 = vrot.lane.b32.xlu0 %v5381_v2, %s5239_s21  ;;  %1623 = vrot.lane.b32.xlu1 %v562_v4, %s5239_s21 }
  0x4b   : > { %1619 = vrot.lane.b32.xlu0 %v5383_v3, %s5239_s21  ;;  %1625 = vrot.lane.b32.xlu1 %v563_v6, %s5239_s21  ;;  %s6529_s21 = smov 24  }
  0x4f   : > { %1800 = vrot.lane.b32.xlu0 %v5381_v2, %s5240_s22  ;;  %1802 = vrot.lane.b32.xlu1 %v562_v4, %s5240_s22 }
  0x53   : > { %1798 = vrot.lane.b32.xlu0 %v5383_v3, %s5240_s22  ;;  %1804 = vrot.lane.b32.xlu1 %v563_v6, %s5240_s22  ;;  %s6506_s22 = smov 25  }
  0x57   : > { %1979 = vrot.lane.b32.xlu0 %v5381_v2, %s5241_s23  ;;  %1981 = vrot.lane.b32.xlu1 %v562_v4, %s5241_s23  ;;  %v4570_v4 = vld [vmem:[%s6524_s1 + $0x70] sm:$0xff] }
  0x5b   : > { %1983 = vrot.lane.b32.xlu1 %v563_v6, %s5241_s23  ;;  %1977 = vrot.lane.b32.xlu0 %v5383_v3, %s5241_s23  ;;  %s6516_s23 = smov 23  }
  0x5f   : > { %2162 = vperm.xlu1 %5038, %v2154_v8   ;;  %2157 = vperm.xlu0 %5037, %v2153_v9  }
  0x63   : > { %2205 = vrot.lane.b32.xlu1 %v5233_v1, %s6506_s22  ;;  %2232 = vrot.lane.b32.xlu0 %v5233_v1, %s6508_s30  ;;  %s6527_s30 = smov 104   ;;  %s6528_s22 = smov 25  }
  0x67   : > { %2265 = vrot.lane.b32.xlu1 %v5233_v1, %s6516_s23  ;;  %2298 = vrot.lane.b32.xlu0 %v5233_v1, %s6514_s24 }
  0x6b   : > { %2343 = vrot.lane.b32.xlu1 %v5233_v1, %s6512_s16  ;;  %2468 = vperm.xlu0 %5037, %v2460_v11  }
  0x6f   : > { %2473 = vperm.xlu1 %5038, %v2461_v12   ;;  %v4571_v12 = vld [vmem:[%s6524_s1 + $0x78] sm:$0xff]  ;;  %2375 = vrot.lane.b32.xlu0 %v5233_v1, %s6510_s20 }
  0x73   : > { %2408 = vrot.lane.b32.xlu1 %v5233_v1, %s6527_s30 }
  0x91   : > { %v572_v15 = vpop.permute.xlu0 %571  ;;  %v570_v16 = vpop.permute.xlu1 %569 }
  0x92   : > { %v582_v21 = vsel %vm579_vm1, %v570_v16, %v572_v15 }
  0x95   : > { %v574_v17 = vpop.permute.xlu0 %573  ;;  %v576_v18 = vpop.permute.xlu1 %575 }
  0x96   : > { %v581_v19 = vsel %vm579_vm1, %v572_v15, %v574_v17  ;;  %v580_v22 = vsel %vm579_vm1, %v574_v17, %v576_v18  ;;  %v4576_v15 = vld [vmem:[%s6524_s1 + $0x80] sm:$0xff] }
  0x97   : > { %590 = vmatprep.subr.mxu0 %v581_v19 }
  0x98   : > { %591 = vmatpush1.msra.mxu0 %v582_v21 }
  0x99   : > { %v906_v23 = vpop.permute.xlu0 %905  ;;  %4532 = vmatmul.mubr.msk.f32.vlgmr.msra.gmra.mrb[0].mxu0 %vm583_vm0, %v4530_v20  ;;  %4703 = vmatprep.subr.mxu0 %v580_v22  ;;  %v908_v24 = vpop.permute.xlu1 %907 }
  0x9a   : > { %4704 = vmatpush3.msra.mxu0 %v580_v22  ;;  %660 = vmatprep.mubr.f32.mxu0 %v5233_v1  ;;  %v913_v33 = vsel %vm911_vm2, %v906_v23, %v908_v24  ;;  %v4577_v22 = vld [vmem:[%s6524_s1 + $0x88] sm:$0xff] }
  0x9b   : > { %748 = vmatprep.subr.mxu0 %v5381_v2 }
  0x9d   : > { %v904_v26 = vpop.permute.xlu0 %903  ;;  %4533 = vmatmul.mubr.msk.f32.gmra.mrb[2].mxu0 %vm583_vm0, %v4531_v25  ;;  %v910_v27 = vpop.permute.xlu1 %909 }
  0x9e   : > { %v912_v28 = vsel %vm911_vm2, %v908_v24, %v910_v27  ;;  %4705 = vmatprep.mubr.msk.f32.mxu0 %vm583_vm0, %v4530_v20  ;;  %v914_v34 = vsel %vm911_vm2, %v904_v26, %v906_v23  ;;  %v2173_v27 = vshrl.u32 %v577_v13, 7 }
  0x9f   : > { %4713 = vmatprep.subr.mxu1 %v912_v28 }
  0xa0   : > { %4714 = vmatpush3.msra.mxu1 %v912_v28  ;;  %v2182_v28 = vsub.s32 2, %v2173_v27 }
  0xa1   : > { %v1085_v31 = vpop.permute.xlu0 %1084  ;;  %4706 = vmatmul.mubr.msk.f32.vlgmr.msra.gmra.mrb[4].mxu0 %vm583_vm0, %v4531_v25  ;;  %4716 = vmatmul.mubr.msk.f32.vlgmr.msra.gmra.mrb[0].mxu1 %vm583_vm0, %v4541_v29  ;;  %v1087_v32 = vpop.permute.xlu1 %1086 }
  0xa2   : > { %749 = vmatpush1.msra.mxu0 %v5383_v3  ;;  %812 = vmatprep.mubr.f32.mxu0 %v5233_v1  ;;  %v1092_v37 = vsel %vm1090_vm3, %v1085_v31, %v1087_v32  ;;  %v4565_v3 = vld [vmem:[%s6524_s1 + $0x68] sm:$0xff] }
  0xa3   : > { %921 = vmatprep.subr.mxu0 %v913_v33  ;;  %4720 = vmatprep.mubr.msk.f32.mxu1 %vm583_vm0, %v4546_v30 }
  0xa5   : > { %v1083_v35 = vpop.permute.xlu0 %1082  ;;  %4536 = vmatmul.mubr.msk.f32.vlgmr.msra.gmra.mrb[0].mxu0 %vm583_vm0, %v5372_v0  ;;  %v1089_v36 = vpop.permute.xlu1 %1088 }
  0xa6   : > { %922 = vmatpush1.msra.mxu0 %v914_v34  ;;  %v1091_v38 = vsel %vm1090_vm3, %v1087_v32, %v1089_v36  ;;  %818 = vmatprep.mubr.f32.mxu0 %v5233_v1  ;;  %v1093_v43 = vsel %vm1090_vm3, %v1083_v35, %v1085_v31 }
  0xa7   : > { %1100 = vmatprep.subr.mxu0 %v1092_v37  ;;  %4718 = vmatprep.subr.mxu1 %v1091_v38 }
  0xa8   : > { %4719 = vmatpush3.msra.mxu1 %v1091_v38 }
  0xa9   : > { %v1264_v41 = vpop.permute.xlu0 %1263  ;;  %4537 = vmatmul.mubr.msk.f32.gmra.mrb[2].mxu0 %vm583_vm0, %v5392_v5  ;;  %4721 = vmatmul.mubr.msk.f32.vlgmr.msra.gmra.mrb[0].mxu1 %vm583_vm0, %v4547_v39  ;;  %v1266_v42 = vpop.permute.xlu1 %1265 }
  0xaa   : > { %985 = vmatprep.mubr.f32.mxu0 %v5233_v1  ;;  %4725 = vmatprep.mubr.msk.f32.mxu1 %vm583_vm0, %v4552_v40  ;;  %v1271_v46 = vsel %vm1269_vm4, %v1264_v41, %v1266_v42 }
  0xad   : > { %v1262_v44 = vpop.permute.xlu0 %1261  ;;  %4542 = vmatmul.mubr.msk.f32.vlgmr.msra.gmra.mrb[0].mxu0 %vm583_vm0, %v5397_v7  ;;  %v1268_v45 = vpop.permute.xlu1 %1267 }
  0xae   : > { %1101 = vmatpush1.msra.mxu0 %v1093_v43  ;;  %v1270_v47 = vsel %vm1269_vm4, %v1266_v42, %v1268_v45  ;;  %991 = vmatprep.mubr.f32.mxu0 %v5233_v1  ;;  %v1272_v52 = vsel %vm1269_vm4, %v1262_v44, %v1264_v41  ;;  %v2174_v44 = vsub.s32 0, %v2173_v27 }
  0xaf   : > { %1279 = vmatprep.subr.mxu0 %v1271_v46  ;;  %4723 = vmatprep.subr.mxu1 %v1270_v47 }
  0xb0   : > { %4724 = vmatpush3.msra.mxu1 %v1270_v47 }
  0xb1   : > { %v1443_v50 = vpop.permute.xlu0 %1442  ;;  %4543 = vmatmul.mubr.msk.f32.gmra.mrb[2].mxu0 %vm583_vm0, %v4541_v29  ;;  %4726 = vmatmul.mubr.msk.f32.vlgmr.msra.gmra.mrb[0].mxu1 %vm583_vm0, %v4553_v48  ;;  %v1445_v51 = vpop.permute.xlu1 %1444  ;;  %v553_v29 = vld [vmem:[%s6500_s12] sm:$0x7] }
  0xb2   : > { %1164 = vmatprep.mubr.f32.mxu0 %v5233_v1  ;;  %4730 = vmatprep.mubr.msk.f32.mxu1 %vm583_vm0, %v4558_v49  ;;  %v1450_v55 = vsel %vm1448_vm5, %v1443_v50, %v1445_v51  ;;  %v5611_v32 = vrot.slane %v553_v29, %v2182_v28  ;;  %v5643_v46 = vrot.slane %v553_v29, %v2174_v44 }
  0xb5   : > { %v1441_v53 = vpop.permute.xlu0 %1440  ;;  %4548 = vmatmul.mubr.msk.f32.vlgmr.msra.gmra.mrb[0].mxu0 %vm583_vm0, %v4546_v30  ;;  %v1447_v54 = vpop.permute.xlu1 %1446 }
  0xb6   : > { %1280 = vmatpush1.msra.mxu0 %v1272_v52  ;;  %v1449_v56 = vsel %vm1448_vm5, %v1445_v51, %v1447_v54  ;;  %1170 = vmatprep.mubr.f32.mxu0 %v5233_v1  ;;  %v1451_v61 = vsel %vm1448_vm5, %v1441_v53, %v1443_v50 }
  0xb7   : > { %1458 = vmatprep.subr.mxu0 %v1450_v55  ;;  %4728 = vmatprep.subr.mxu1 %v1449_v56 }
  0xb8   : > { %4729 = vmatpush3.msra.mxu1 %v1449_v56 }
  0xb9   : > { %v1622_v59 = vpop.permute.xlu0 %1621  ;;  %4549 = vmatmul.mubr.msk.f32.gmra.mrb[2].mxu0 %vm583_vm0, %v4547_v39  ;;  %4731 = vmatmul.mubr.msk.f32.vlgmr.msra.gmra.mrb[0].mxu1 %vm583_vm0, %v4559_v57  ;;  %v1624_v60 = vpop.permute.xlu1 %1623 }
  0xba   : > { %1343 = vmatprep.mubr.f32.mxu0 %v5233_v1  ;;  %4735 = vmatprep.mubr.msk.f32.mxu1 %vm583_vm0, %v4564_v58  ;;  %v1629_v0 = vsel %vm1627_vm6, %v1622_v59, %v1624_v60 }
  0xbd   : > { %v1620_v62 = vpop.permute.xlu0 %1619  ;;  %4554 = vmatmul.mubr.msk.f32.vlgmr.msra.gmra.mrb[0].mxu0 %vm583_vm0, %v4552_v40  ;;  %v1626_v63 = vpop.permute.xlu1 %1625 }
  0xbe   : > { %1459 = vmatpush1.msra.mxu0 %v1451_v61  ;;  %v1628_v2 = vsel %vm1627_vm6, %v1624_v60, %v1626_v63  ;;  %1349 = vmatprep.mubr.f32.mxu0 %v5233_v1  ;;  %v1630_v7 = vsel %vm1627_vm6, %v1620_v62, %v1622_v59 }
  0xbf   : > { %1637 = vmatprep.subr.mxu0 %v1629_v0  ;;  %4733 = vmatprep.subr.mxu1 %v1628_v2 }
  0xc0   : > { %4734 = vmatpush3.msra.mxu1 %v1628_v2 }
  0xc1   : > { %v1801_v5 = vpop.permute.xlu0 %1800  ;;  %4555 = vmatmul.mubr.msk.f32.gmra.mrb[2].mxu0 %vm583_vm0, %v4553_v48  ;;  %4736 = vmatmul.mubr.msk.f32.vlgmr.msra.gmra.mrb[0].mxu1 %vm583_vm0, %v4565_v3  ;;  %v1803_v6 = vpop.permute.xlu1 %1802  ;;  %v2178_v48 = vsub.s32 1, %v2173_v27 }
  0xc2   : > { %1522 = vmatprep.mubr.f32.mxu0 %v5233_v1  ;;  %4740 = vmatprep.mubr.msk.f32.mxu1 %vm583_vm0, %v4570_v4  ;;  %v1808_v10 = vsel %vm1806_vm7, %v1801_v5, %v1803_v6 }
  0xc3   : > { %v5664_v50 = vrot.slane %v553_v29, %v2178_v48 }
  0xc5   : > { %v1799_v8 = vpop.permute.xlu0 %1798  ;;  %4560 = vmatmul.mubr.msk.f32.vlgmr.msra.gmra.mrb[0].mxu0 %vm583_vm0, %v4558_v49  ;;  %v1805_v9 = vpop.permute.xlu1 %1804 }
  0xc6   : > { %1638 = vmatpush1.msra.mxu0 %v1630_v7  ;;  %v1807_v11 = vsel %vm1806_vm7, %v1803_v6, %v1805_v9  ;;  %1528 = vmatprep.mubr.f32.mxu0 %v5233_v1  ;;  %v1809_v17 = vsel %vm1806_vm7, %v1799_v8, %v1801_v5 }
  0xc7   : > { %1816 = vmatprep.subr.mxu0 %v1808_v10  ;;  %4738 = vmatprep.subr.mxu1 %v1807_v11 }
  0xc8   : > { %4739 = vmatpush3.msra.mxu1 %v1807_v11 }
  0xc9   : > { %4561 = vmatmul.mubr.msk.f32.gmra.mrb[2].mxu0 %vm583_vm0, %v4559_v57  ;;  %4741 = vmatmul.mubr.msk.f32.vlgmr.msra.gmra.mrb[0].mxu1 %vm583_vm0, %v4571_v12  ;;  %v1982_v16 = vpop.permute.xlu1 %1981  ;;  %v1980_v18 = vpop.permute.xlu0 %1979 }
  0xca   : > { %1701 = vmatprep.mubr.f32.mxu0 %v5233_v1  ;;  %4745 = vmatprep.mubr.msk.f32.mxu1 %vm583_vm0, %v4576_v15  ;;  %v1987_v20 = vsel %vm1985_vm8, %v1980_v18, %v1982_v16 }
  0xcd   : > { %4566 = vmatmul.mubr.msk.f32.vlgmr.msra.gmra.mrb[0].mxu0 %vm583_vm0, %v4564_v58  ;;  %v1984_v19 = vpop.permute.xlu1 %1983  ;;  %v1978_v23 = vpop.permute.xlu0 %1977 }
  0xce   : > { %1817 = vmatpush1.msra.mxu0 %v1809_v17  ;;  %v1986_v21 = vsel %vm1985_vm8, %v1982_v16, %v1984_v19  ;;  %1707 = vmatprep.mubr.f32.mxu0 %v5233_v1  ;;  %v1988_v24 = vsel %vm1985_vm8, %v1978_v23, %v1980_v18 }
  0xcf   : > { %1995 = vmatprep.subr.mxu0 %v1987_v20  ;;  %4743 = vmatprep.subr.mxu1 %v1986_v21 }
  0xd0   : > { %4744 = vmatpush3.msra.mxu1 %v1986_v21 }
  0xd1   : > { %4567 = vmatmul.mubr.msk.f32.gmra.mrb[2].mxu0 %vm583_vm0, %v4565_v3  ;;  %4746 = vmatmul.mubr.msk.f32.vlgmr.msra.gmra.mrb[0].mxu1 %vm583_vm0, %v4577_v22 }
  0xd2   : > { %1880 = vmatprep.mubr.f32.mxu0 %v5233_v1 }
  0xd5   : > { %4572 = vmatmul.mubr.msk.f32.vlgmr.msra.gmra.mrb[0].mxu0 %vm583_vm0, %v4570_v4 }
  0xd6   : > { %1886 = vmatprep.mubr.f32.mxu0 %v5233_v1  ;;  %1996 = vmatpush1.msra.mxu0 %v1988_v24 }
  0xd9   : > { %4573 = vmatmul.mubr.msk.f32.gmra.mrb[2].mxu0 %vm583_vm0, %v4571_v12 }
  0xda   : > { %2059 = vmatprep.mubr.f32.mxu0 %v5233_v1 }
  0xdd   : > { %4578 = vmatmul.mubr.msk.f32.vlgmr.msra.gmra.mrb[0].mxu0 %vm583_vm0, %v4576_v15 }
  0xde   : > { %2065 = vmatprep.mubr.f32.mxu0 %v5233_v1  ;;  %v2163_v34 = vpop.permute.xlu1 %2162  ;;  %v2158_v13 = vpop.permute.xlu0 %2157 }
  0xe1   : > { %4579 = vmatmul.mubr.msk.f32.gmra.mrb[2].mxu0 %vm583_vm0, %v4577_v22 }
  0xe2   : > { %2704 = vmatprep.mubr.f32.mxu0 %v5233_v1  ;;  %v5723_v56 = vpop.permute.xlu1 %2205  ;;  %v5731_v58 = vpop.permute.xlu0 %2232 }
  0xe6   : > { %v5729_v57 = vpop.permute.xlu1 %2265  ;;  %v5741_v60 = vpop.permute.xlu0 %2298 }
  0xea   : > { %v5739_v59 = vpop.permute.xlu1 %2343  ;;  %v5745_v62 = vpop.permute.xlu0 %2468 }
  0xee   : > { %v5743_v61 = vpop.permute.xlu1 %2473  ;;  %v5747_v63 = vpop.permute.xlu0 %2375 }
  0xf2   : > { %v5749_v0 = vpop.permute.xlu1 %2408 }
 0x174   : > { %v4707_v25 = vpop.f32.mrb[4].mxu0 }
 0x175   : > { %v733_v26 = vpop.f32.mrb[5].mxu0 }
 0x1a4   : > { %v4747_v30 = vpop.f32.mrb[0].mxu1 }
 0x1a5   : > { %v4883_v31 = vadd.f32 %v4747_v30, %v4707_v25  ;;  %v2138_v33 = vpop.f32.mrb[1].mxu1 }
 0x1a6   : > { %v4884_v35 = vadd.f32 %v2138_v33, %v733_v26 }
 0x1a7   : > { %v2170_v36 = vadd.f32 %v4883_v31, %v2163_v34 }
 0x1a8   : > { %v2167_v38 = vadd.f32 %v4884_v35, %v2158_v13 }
 0x1a9   : > { %v5614_v37 = vmul.f32 %v5611_v32, %v2170_v36 }
 0x1aa   : > { %v5625_v40 = vmul.f32 %v5611_v32, %v2167_v38 }
 0x1ab   : > { %2263 = vrot.lane.b32.xlu1 %v5614_v37, %s6516_s23  ;;  %2203 = vrot.lane.b32.xlu0 %v5614_v37, %s6528_s22 }
 0x1af   : > { %2373 = vrot.lane.b32.xlu1 %v5614_v37, %s6510_s20  ;;  %2230 = vrot.lane.b32.xlu0 %v5614_v37, %s6529_s21 }
 0x1b0   : > { %v2061_v39 = vpop.f32.mrb[0].mxu0 }
 0x1b1   : > { %v2063_v41 = vpop.f32.mrb[1].mxu0  ;;  %v2165_v45 = vadd.f32 %v2158_v13, %v2061_v39 }
 0x1b2   : > { %v2166_v49 = vadd.f32 %v2158_v13, %v2063_v41 }
 0x1b3   : > { %2201 = vrot.lane.b32.xlu1 %v5625_v40, %s6528_s22  ;;  %2296 = vrot.lane.b32.xlu0 %v5614_v37, %s6514_s24  ;;  %v5650_v47 = vmul.f32 %v5643_v46, %v2165_v45 }
 0x1b4   : > { %v2067_v42 = vpop.f32.mrb[2].mxu0  ;;  %v5671_v51 = vmul.f32 %v5664_v50, %v2166_v49 }
 0x1b5   : > { %v2069_v43 = vpop.f32.mrb[3].mxu0  ;;  %v2168_v52 = vadd.f32 %v2163_v34, %v2067_v42 }
 0x1b6   : > { %v2169_v54 = vadd.f32 %v2163_v34, %v2069_v43 }
 0x1b7   : > { %2228 = vrot.lane.b32.xlu1 %v5625_v40, %s6529_s21  ;;  %2341 = vrot.lane.b32.xlu0 %v5614_v37, %s6512_s16  ;;  %v5690_v53 = vmul.f32 %v5643_v46, %v2168_v52 }
 0x1b8   : > { %v5709_v55 = vmul.f32 %v5664_v50, %v2169_v54 }
 0x1bb   : > { %2294 = vrot.lane.b32.xlu1 %v5625_v40, %s6514_s24  ;;  %2406 = vrot.lane.b32.xlu0 %v5614_v37, %s6527_s30 }
 0x1bf   : > { %2339 = vrot.lane.b32.xlu1 %v5625_v40, %s6512_s16  ;;  %2261 = vrot.lane.b32.xlu0 %v5625_v40, %s6516_s23 }
 0x1c3   : > { %2404 = vrot.lane.b32.xlu1 %v5625_v40, %s6527_s30  ;;  %2371 = vrot.lane.b32.xlu0 %v5625_v40, %s6510_s20 }
 0x1c7   : > { %2193 = vrot.lane.b32.xlu1 %v5650_v47, %s6528_s22  ;;  %2220 = vrot.lane.b32.xlu0 %v5650_v47, %s6529_s21 }
 0x1cb   : > { %2253 = vrot.lane.b32.xlu1 %v5650_v47, %s6516_s23  ;;  %2286 = vrot.lane.b32.xlu0 %v5650_v47, %s6514_s24 }
 0x1cf   : > { %2331 = vrot.lane.b32.xlu1 %v5650_v47, %s6512_s16  ;;  %2363 = vrot.lane.b32.xlu0 %v5650_v47, %s6510_s20 }
 0x1d3   : > { %2396 = vrot.lane.b32.xlu1 %v5650_v47, %s6527_s30  ;;  %2428 = vrot.lane.b32.xlu0 %v5650_v47, %s6530_s15 }
 0x1d7   : > { %2197 = vrot.lane.b32.xlu1 %v5671_v51, %s6528_s22  ;;  %2224 = vrot.lane.b32.xlu0 %v5671_v51, %s6529_s21 }
 0x1db   : > { %2257 = vrot.lane.b32.xlu1 %v5671_v51, %s6516_s23  ;;  %2290 = vrot.lane.b32.xlu0 %v5671_v51, %s6514_s24 }
 0x1df   : > { %2335 = vrot.lane.b32.xlu1 %v5671_v51, %s6512_s16  ;;  %2367 = vrot.lane.b32.xlu0 %v5671_v51, %s6510_s20 }
 0x1e3   : > { %2400 = vrot.lane.b32.xlu1 %v5671_v51, %s6527_s30  ;;  %2432 = vrot.lane.b32.xlu0 %v5671_v51, %s6530_s15 }
 0x1e7   : > { %2222 = vrot.lane.b32.xlu1 %v5690_v53, %s6529_s21  ;;  %2195 = vrot.lane.b32.xlu0 %v5690_v53, %s6528_s22 }
 0x1eb   : > { %2288 = vrot.lane.b32.xlu1 %v5690_v53, %s6514_s24  ;;  %2255 = vrot.lane.b32.xlu0 %v5690_v53, %s6516_s23 }
 0x1ef   : > { %2365 = vrot.lane.b32.xlu1 %v5690_v53, %s6510_s20  ;;  %2333 = vrot.lane.b32.xlu0 %v5690_v53, %s6512_s16 }
 0x1f3   : > { %2430 = vrot.lane.b32.xlu1 %v5690_v53, %s6530_s15  ;;  %2398 = vrot.lane.b32.xlu0 %v5690_v53, %s6527_s30 }
 0x1f7   : > { %2226 = vrot.lane.b32.xlu1 %v5709_v55, %s6529_s21  ;;  %2199 = vrot.lane.b32.xlu0 %v5709_v55, %s6528_s22 }
 0x1fb   : > { %2292 = vrot.lane.b32.xlu1 %v5709_v55, %s6514_s24  ;;  %2259 = vrot.lane.b32.xlu0 %v5709_v55, %s6516_s23  ;;  %s6534_s24 = smov 127  }
 0x1ff   : > { %2369 = vrot.lane.b32.xlu1 %v5709_v55, %s6510_s20  ;;  %2436 = vrot.lane.b32.xlu0 %v5625_v40, %s6530_s15  ;;  %s4520_s20 = sshll.u32 %s5341_s29, 1 }
 0x200   : > { %p522_p11 = scmp.lt.s32.totalorder %s4520_s20, 3 }
 0x202   : > { %s6541_s20 = smov (!%p522_p11, %s4520_s20), 3 }
 0x203   : > { %2434 = vrot.lane.b32.xlu1 %v5709_v55, %s6530_s15  ;;  %2337 = vrot.lane.b32.xlu0 %v5709_v55, %s6512_s16  ;;  %s4980_s16 = smul.u32 24, %s6541_s20 }
 0x205   : > { %s5867_s0 = scalar_lea.vmem %s6531_s3, %s4980_s16  ;;  %s5996_s16 = sshll.u32 %s6541_s20, 3 }
 0x206   : > { %s532_s1 = scalar_lea.vmem %s6493_s5, %s5996_s16  ;;  %s538_s23 = scalar_lea.vmem %s6494_s6, %s5996_s16 }
 0x207   : > { %2438 = vrot.lane.b32.xlu1 %v5614_v37, %s6530_s15  ;;  %2402 = vrot.lane.b32.xlu0 %v5709_v55, %s6527_s30  ;;  %s6532_s20 = smov 23   ;;  %s5248_s3 = smov [#allocation2]  }
 0x20b   : > { %2440 = vrot.lane.b32.xlu0 %v5233_v1, %s6530_s15 }
 0x21d   : > { %v5751_v2 = vpop.permute.xlu0 %2203  ;;  %v5753_v3 = vpop.permute.xlu1 %2263 }
 0x221   : > { %v5755_v4 = vpop.permute.xlu0 %2230  ;;  %v5757_v5 = vpop.permute.xlu1 %2373 }
 0x225   : > { %v5759_v6 = vpop.permute.xlu0 %2296  ;;  %v2202_v7 = vpop.permute.xlu1 %2201 }
 0x229   : > { %v5761_v8 = vpop.permute.xlu0 %2341  ;;  %v2229_v9 = vpop.permute.xlu1 %2228 }
 0x22d   : > { %v5763_v10 = vpop.permute.xlu0 %2406  ;;  %v2295_v11 = vpop.permute.xlu1 %2294 }
 0x231   : > { %v2262_v12 = vpop.permute.xlu0 %2261  ;;  %v2340_v15 = vpop.permute.xlu1 %2339 }
 0x235   : > { %v2372_v16 = vpop.permute.xlu0 %2371  ;;  %v2405_v17 = vpop.permute.xlu1 %2404 }
 0x239   : > { %v2221_v18 = vpop.permute.xlu0 %2220  ;;  %v2194_v19 = vpop.permute.xlu1 %2193 }
 0x23d   : > { %v5765_v20 = vpop.permute.xlu0 %2286  ;;  %v5767_v21 = vpop.permute.xlu1 %2253 }
 0x241   : > { %v5769_v22 = vpop.permute.xlu0 %2363  ;;  %v5771_v23 = vpop.permute.xlu1 %2331 }
 0x245   : > { %v5773_v24 = vpop.permute.xlu0 %2428  ;;  %v5775_v25 = vpop.permute.xlu1 %2396 }
 0x249   : > { %v2225_v26 = vpop.permute.xlu0 %2224  ;;  %v2198_v27 = vpop.permute.xlu1 %2197 }
 0x24a   : > { %v2235_v28 = vsel %vm2234_vm9, %v2225_v26, %v2229_v9  ;;  %v2237_v29 = vsel %vm2234_vm9, %v2221_v18, %v2225_v26  ;;  %v2208_v30 = vsel %vm2207_vm10, %v2198_v27, %v2202_v7  ;;  %v2210_v31 = vsel %vm2207_vm10, %v2194_v19, %v2198_v27 }
 0x24b   : > { %v2242_v33 = vmul.f32 0.125, %v2237_v29  ;;  %v2243_v34 = vmul.f32 0.125, %v2235_v28  ;;  %v2215_v35 = vmul.f32 0.0625, %v2210_v31  ;;  %v2216_v36 = vmul.f32 0.0625, %v2208_v30 }
 0x24c   : > { %v2321_v28 = vmul.f32 0.25, %v5625_v40  ;;  %v2320_v31 = vmul.f32 0.25, %v5671_v51  ;;  %v2410_v40 = vsel %vm1090_vm3, %v2405_v17, %v5749_v0 }
 0x24d   : > { %v2249_v13 = vadd.f32 %v2243_v34, %v2216_v36  ;;  %v2291_v38 = vpop.permute.xlu0 %2290  ;;  %v2258_v39 = vpop.permute.xlu1 %2257  ;;  %v2248_v45 = vadd.f32 %v2242_v33, %v2215_v35  ;;  %v2378_v33 = vsel %vm2377_vm13, %v2372_v16, %v5747_v63 }
 0x24e   : > { %v2301_v41 = vsel %vm2300_vm11, %v2291_v38, %v2295_v11  ;;  %v2303_v42 = vsel %vm2300_vm11, %v5765_v20, %v2291_v38  ;;  %v2268_v43 = vsel %vm2267_vm12, %v2258_v39, %v2262_v12  ;;  %v2270_v44 = vsel %vm2267_vm12, %v5767_v21, %v2258_v39 }
 0x24f   : > { %v2275_v48 = vmul.f32 0.0625, %v2270_v44  ;;  %v2276_v49 = vmul.f32 0.0625, %v2268_v43  ;;  %v2308_v52 = vmul.f32 0.125, %v2303_v42  ;;  %v2309_v54 = vmul.f32 0.125, %v2301_v41 }
 0x250   : > { %v2345_v12 = vsel %vm579_vm1, %v2340_v15, %v5739_v59  ;;  %v2386_v41 = vmul.f32 0.0625, %v2378_v33  ;;  %v2239_v44 = vsel %vm2234_vm9, %v5731_v58, %v2221_v18  ;;  %v2305_v33 = vsel %vm2300_vm11, %v5741_v60, %v5765_v20 }
 0x251   : > { %v2281_v7 = vadd.f32 %v2275_v48, %v2248_v45  ;;  %v2282_v9 = vadd.f32 %v2276_v49, %v2249_v13  ;;  %v5799_v26 = vpop.permute.xlu0 %2367  ;;  %v2336_v11 = vpop.permute.xlu1 %2335  ;;  %v2353_v35 = vmul.f32 0.125, %v2345_v12  ;;  %v2212_v45 = vsel %vm2207_vm10, %v5723_v56, %v2194_v19 }
 0x252   : > { %v2347_v27 = vsel %vm579_vm1, %v2336_v11, %v2340_v15  ;;  %v2380_v34 = vsel %vm2377_vm13, %v5799_v26, %v2372_v16  ;;  %v2418_v48 = vmul.f32 0.125, %v2410_v40  ;;  %v2241_v12 = vmul.f32 0.125, %v2239_v44 }
 0x253   : > { %v2314_v29 = vadd.f32 %v2308_v52, %v2281_v7  ;;  %v2315_v30 = vadd.f32 %v2309_v54, %v2282_v9  ;;  %v2352_v38 = vmul.f32 0.125, %v2347_v27  ;;  %v2385_v16 = vmul.f32 0.0625, %v2380_v34 }
 0x254   : > { %v2214_v27 = vmul.f32 0.0625, %v2212_v45  ;;  %v2349_v20 = vsel %vm579_vm1, %v5771_v23, %v2336_v11  ;;  %v2319_v44 = vmul.f32 0.25, %v5650_v47  ;;  %v557_v11 = vld [vmem:[%s5867_s0 + $0x18] sm:$0xff]  ;;  %v555_v45 = vld [vmem:[%s5867_s0 + $0x8] sm:$0xff] }
 0x255   : > { %v2327_v36 = vadd.f32 %v2321_v28, %v2315_v30  ;;  %v2326_v13 = vadd.f32 %v2320_v31, %v2314_v29  ;;  %v5815_v39 = vpop.permute.xlu0 %2432  ;;  %v5817_v15 = vpop.permute.xlu1 %2400  ;;  %v2351_v23 = vmul.f32 0.125, %v2349_v20 }
 0x256   : > { %v2412_v51 = vsel %vm1090_vm3, %v5817_v15, %v2405_v17  ;;  %v2272_v17 = vsel %vm2267_vm12, %v5729_v57, %v5767_v21  ;;  %v2247_v31 = vadd.f32 %v2241_v12, %v2214_v27 }
 0x257   : > { %v2359_v42 = vadd.f32 %v2353_v35, %v2327_v36  ;;  %v2358_v43 = vadd.f32 %v2352_v38, %v2326_v13  ;;  %v2417_v52 = vmul.f32 0.125, %v2412_v51  ;;  %v2274_v29 = vmul.f32 0.0625, %v2272_v17 }
 0x258   : > { %v2307_v38 = vmul.f32 0.125, %v2305_v33 }
 0x259   : > { %v2391_v49 = vadd.f32 %v2385_v16, %v2358_v43  ;;  %v2196_v54 = vpop.permute.xlu0 %2195  ;;  %v2223_v7 = vpop.permute.xlu1 %2222  ;;  %v2392_v9 = vadd.f32 %v2386_v41, %v2359_v42  ;;  %v2280_v34 = vadd.f32 %v2274_v29, %v2247_v31 }
 0x25a   : > { %v2213_v36 = vsel %vm2207_vm10, %v5723_v56, %v2196_v54  ;;  %v2240_v13 = vsel %vm2234_vm9, %v5731_v58, %v2223_v7 }
 0x25b   : > { %v5836_v28 = vadd.f32 %v2417_v52, %v2391_v49  ;;  %v5838_v18 = vadd.f32 %v2418_v48, %v2392_v9  ;;  %v2313_v40 = vadd.f32 %v2307_v38, %v2280_v34  ;;  %v2217_v51 = vmul.f32 0.0625, %v2213_v36 }
 0x25c   : > { %v2244_v41 = vmul.f32 0.125, %v2240_v13  ;;  %v2382_v48 = vsel %vm2377_vm13, %v5769_v22, %v5799_v26  ;;  %v5890_v36 = vmul.f32 %v5743_v61, %v557_v11  ;;  %v5893_v13 = vmul.f32 %v5745_v62, %v555_v45 }
 0x25d   : > { %v2256_v19 = vpop.permute.xlu0 %2255  ;;  %v2289_v30 = vpop.permute.xlu1 %2288  ;;  %v2325_v49 = vadd.f32 %v2319_v44, %v2313_v40  ;;  %v2384_v38 = vmul.f32 0.0625, %v2382_v48  ;;  %v2379_v45 = vsel %vm2377_vm13, %v5757_v5, %v5747_v63 }
 0x25e   : > { %v2273_v43 = vsel %vm2267_vm12, %v5729_v57, %v2256_v19  ;;  %v2250_v52 = vadd.f32 %v2244_v41, %v2217_v51 }
 0x25f   : > { %v2277_v9 = vmul.f32 0.0625, %v2273_v43 }
 0x261   : > { %v5846_v21 = vpop.permute.xlu0 %2333  ;;  %v5848_v35 = vpop.permute.xlu1 %2365 }
 0x265   : > { %v5860_v42 = vpop.permute.xlu0 %2398  ;;  %v5862_v16 = vpop.permute.xlu1 %2430 }
 0x269   : > { %v2200_v17 = vpop.permute.xlu0 %2199  ;;  %v2227_v12 = vpop.permute.xlu1 %2226 }
 0x26a   : > { %v2209_v27 = vsel %vm2207_vm10, %v2200_v17, %v5751_v2  ;;  %v2211_v47 = vsel %vm2207_vm10, %v2196_v54, %v2200_v17  ;;  %v2236_v29 = vsel %vm2234_vm9, %v2227_v12, %v5755_v4  ;;  %v2238_v31 = vsel %vm2234_vm9, %v2223_v7, %v2227_v12 }
 0x26b   : > { %v2218_v22 = vmul.f32 0.0625, %v2211_v47  ;;  %v2219_v26 = vmul.f32 0.0625, %v2209_v27  ;;  %v2245_v33 = vmul.f32 0.125, %v2238_v31  ;;  %v2246_v34 = vmul.f32 0.125, %v2236_v29 }
 0x26c   : > { %v2357_v2 = vadd.f32 %v2351_v23, %v2325_v49  ;;  %v2414_v4 = vsel %vm1090_vm3, %v5775_v25, %v5817_v15  ;;  %v2283_v54 = vadd.f32 %v2277_v9, %v2250_v52  ;;  %v2306_v7 = vsel %vm2300_vm11, %v5741_v60, %v2289_v30 }
 0x26d   : > { %v2260_v40 = vpop.permute.xlu0 %2259  ;;  %v2293_v20 = vpop.permute.xlu1 %2292  ;;  %v2251_v15 = vadd.f32 %v2245_v33, %v2218_v22  ;;  %v2252_v44 = vadd.f32 %v2246_v34, %v2219_v26  ;;  %v2416_v48 = vmul.f32 0.125, %v2414_v4  ;;  %v2310_v49 = vmul.f32 0.125, %v2306_v7 }
 0x26e   : > { %v2269_v51 = vsel %vm2267_vm12, %v2260_v40, %v5753_v3  ;;  %v2271_v41 = vsel %vm2267_vm12, %v2256_v19, %v2260_v40  ;;  %v2302_v43 = vsel %vm2300_vm11, %v2293_v20, %v5759_v6  ;;  %v2304_v25 = vsel %vm2300_vm11, %v2289_v30, %v2293_v20 }
 0x26f   : > { %v2278_v23 = vmul.f32 0.0625, %v2271_v41  ;;  %v2279_v11 = vmul.f32 0.0625, %v2269_v51  ;;  %v2390_v3 = vadd.f32 %v2384_v38, %v2357_v2  ;;  %v2311_v9 = vmul.f32 0.125, %v2304_v25 }
 0x270   : > { %v2312_v17 = vmul.f32 0.125, %v2302_v43  ;;  %v2346_v30 = vsel %vm579_vm1, %v5761_v8, %v5739_v59  ;;  %v2446_v27 = vsel %vm1269_vm4, %v5773_v24, %v5815_v39  ;;  %v2316_v47 = vadd.f32 %v2310_v49, %v2283_v54 }
 0x271   : > { %v2284_v19 = vadd.f32 %v2278_v23, %v2251_v15  ;;  %v2285_v52 = vadd.f32 %v2279_v11, %v2252_v44  ;;  %v2437_v6 = vpop.permute.xlu0 %2436  ;;  %v2370_v12 = vpop.permute.xlu1 %2369  ;;  %v2324_v31 = vmul.f32 0.25, %v5614_v37  ;;  %v2322_v33 = vmul.f32 0.25, %v5690_v53  ;;  %v5948_v11 = vld [vmem:[%s5867_s0 + $0x20] sm:$0xff] }
 0x272   : > { %v2444_v29 = vsel %vm1269_vm4, %v5815_v39, %v2437_v6  ;;  %v2389_v34 = vmul.f32 0.0625, %v2379_v45  ;;  %v2422_v2 = vadd.f32 %v2416_v48, %v2390_v3  ;;  %v2323_v4 = vmul.f32 0.25, %v5709_v55 }
 0x273   : > { %v2317_v22 = vadd.f32 %v2311_v9, %v2284_v19  ;;  %v2318_v26 = vadd.f32 %v2312_v17, %v2285_v52  ;;  %v2449_v38 = vmul.f32 0.0625, %v2444_v29  ;;  %v2356_v7 = vmul.f32 0.125, %v2346_v30 }
 0x274   : > { %v2448_v40 = vmul.f32 0.0625, %v2446_v27  ;;  %v2383_v24 = vsel %vm2377_vm13, %v5848_v35, %v2370_v12  ;;  %v2381_v53 = vsel %vm2377_vm13, %v2370_v12, %v5757_v5  ;;  %v2328_v54 = vadd.f32 %v2322_v33, %v2316_v47 }
 0x275   : > { %v2330_v20 = vadd.f32 %v2324_v31, %v2318_v26  ;;  %v2338_v39 = vpop.permute.xlu0 %2337  ;;  %v2435_v37 = vpop.permute.xlu1 %2434  ;;  %v2329_v43 = vadd.f32 %v2323_v4, %v2317_v22  ;;  %v2411_v15 = vsel %vm1090_vm3, %v5763_v10, %v5749_v0  ;;  %v2455_v5 = vadd.f32 %v2449_v38, %v5836_v28  ;;  %v5970_v22 = vld [vmem:[%s5867_s0 + $0x28] sm:$0xff]  ;;  %v5973_v26 = vld [vmem:[%s5867_s0 + $0x10] sm:$0xff] }
 0x276   : > { %v2348_v55 = vsel %vm579_vm1, %v2338_v39, %v5761_v8  ;;  %v2350_v51 = vsel %vm579_vm1, %v5846_v21, %v2338_v39  ;;  %v2454_v44 = vadd.f32 %v2448_v40, %v2422_v2  ;;  %v2387_v23 = vmul.f32 0.0625, %v2383_v24  ;;  %v5951_v8 = vld [vmem:[%s5867_s0] sm:$0xff] }
 0x277   : > { %v2362_v41 = vadd.f32 %v2356_v7, %v2330_v20  ;;  %v2354_v25 = vmul.f32 0.125, %v2350_v51  ;;  %v2355_v35 = vmul.f32 0.125, %v2348_v55  ;;  %v2388_v45 = vmul.f32 0.0625, %v2381_v53 }
 0x278   : > { %v2447_v48 = vsel %vm1269_vm4, %v5862_v16, %v2435_v37  ;;  %v2480_v16 = vmul.f32 %v5743_v61, %v5948_v11  ;;  %v2476_v29 = vmul.f32 %v5745_v62, %v5951_v8  ;;  %v2421_v31 = vmul.f32 0.125, %v2411_v15 }
 0x279   : > { %v2360_v3 = vadd.f32 %v2354_v25, %v2328_v54  ;;  %v2361_v21 = vadd.f32 %v2355_v35, %v2329_v43  ;;  %v2403_v49 = vpop.permute.xlu0 %2402  ;;  %v2439_v19 = vpop.permute.xlu1 %2438  ;;  %v2395_v52 = vadd.f32 %v2389_v34, %v2362_v41  ;;  %v2481_v53 = vmul.f32 %v5743_v61, %v5970_v22 }
 0x27a   : > { %v2413_v28 = vsel %vm1090_vm3, %v2403_v49, %v5763_v10  ;;  %v2415_v9 = vsel %vm1090_vm3, %v5860_v42, %v2403_v49  ;;  %v2445_v17 = vsel %vm1269_vm4, %v2435_v37, %v2439_v19  ;;  %v2483_v10 = vadd.f32 %v5893_v13, %v2455_v5 }
 0x27b   : > { %v2393_v12 = vadd.f32 %v2387_v23, %v2360_v3  ;;  %v2394_v30 = vadd.f32 %v2388_v45, %v2361_v21  ;;  %v2419_v27 = vmul.f32 0.125, %v2415_v9  ;;  %v2420_v47 = vmul.f32 0.125, %v2413_v28  ;;  %v2462_v21 = vld [vmem:[%s532_s1] sm:$0xff] }
 0x27c   : > { %v2451_v42 = vmul.f32 0.0625, %v2447_v48  ;;  %v2452_v2 = vmul.f32 0.0625, %v2445_v17  ;;  %v2482_v40 = vadd.f32 %v2476_v29, %v2454_v44  ;;  %v2427_v13 = vadd.f32 %v2421_v31, %v2395_v52 }
 0x27d   : > { %v2425_v33 = vadd.f32 %v2419_v27, %v2393_v12  ;;  %v2426_v34 = vadd.f32 %v2420_v47, %v2394_v30  ;;  %v5975_v38 = vpop.permute.xlu0 %2440  ;;  %v2478_v54 = vmul.f32 %v5745_v62, %v5973_v26  ;;  %v2489_v55 = vmul.f32 %v2483_v10, %v5664_v50 }
 0x27e   : > { %v2442_v4 = vsel %vm1269_vm4, %v2437_v6, %v5975_v38  ;;  %v2443_v7 = vsel %vm1269_vm4, %v2439_v19, %v5975_v38  ;;  %v2488_v25 = vmul.f32 %v2482_v40, %v5643_v46 }
 0x27f   : > { %v2457_v20 = vadd.f32 %v2451_v42, %v2425_v33  ;;  %v2458_v24 = vadd.f32 %v2452_v2, %v2426_v34  ;;  %v2450_v39 = vmul.f32 0.0625, %v2442_v4  ;;  %v2453_v37 = vmul.f32 0.0625, %v2443_v7 }
 0x280   : > { %v2494_v62 = vadd.f32 %v2489_v55, %v2488_v25 }
 0x281   : > { %v2486_v51 = vadd.f32 %v2480_v16, %v2458_v24  ;;  %v2456_v6 = vadd.f32 %v2450_v39, %v5838_v18  ;;  %v2459_v41 = vadd.f32 %v2453_v37, %v2427_v13  ;;  %v2485_v43 = vadd.f32 %v5890_v36, %v2457_v20  ;;  %v2463_v36 = vld [vmem:[%s532_s1 + $0x8] sm:$0xff]  ;;  %v2464_v37 = vld [vmem:[%s538_s23] sm:$0xff]  ;;  %s6535_s1 = smov 105  }
 0x283   : > { %v2484_v35 = vadd.f32 %v2478_v54, %v2456_v6  ;;  %v2487_v15 = vadd.f32 %v2481_v53, %v2459_v41  ;;  %v2491_v44 = vmul.f32 %v2485_v43, %v5643_v46  ;;  %v2492_v61 = vmul.f32 %v2486_v51, %v5664_v50  ;;  %v2465_v53 = vld [vmem:[%s538_s23 + $0x8] sm:$0xff]  ;;  %s6533_s23 = smov 1  }
 0x285   : > { %v2490_v5 = vmul.f32 %v2484_v35, %v5611_v32  ;;  %v2493_v23 = vmul.f32 %v2487_v15, %v5611_v32  ;;  %v2498_v45 = vadd.f32 %v2492_v61, %v2491_v44 }
 0x287   : > { %v2495_v3 = vadd.f32 %v2494_v62, %v2490_v5  ;;  %v2499_v18 = vadd.f32 %v2498_v45, %v2493_v23 }
 0x289   : > { %2496 = vadd.xlane.f32.xlu1 %v2495_v3  ;;  %2500 = vadd.xlane.f32.xlu0 %v2499_v18 }
 0x29a   : > { %2549 = vperm.xlu1 %5038, %v2463_v36  }
 0x29f   : > { %2544 = vperm.xlu0 %5037, %v2462_v21  }
 0x316   : > { %v2501_v48 = vpop.xlane.xlu0 %2500  ;;  %v2497_v49 = vpop.xlane.xlu1 %2496 }
 0x317   : > { %v2503_v19 = vmul.f32 0.00390625, %v2501_v48  ;;  %v2502_v52 = vmul.f32 0.00390625, %v2497_v49 }
 0x319   : > { %v2507_v28 = vsub.f32 %v2485_v43, %v2503_v19  ;;  %v2508_v9 = vsub.f32 %v2486_v51, %v2503_v19  ;;  %v2509_v17 = vsub.f32 %v2487_v15, %v2503_v19  ;;  %v2504_v12 = vsub.f32 %v2482_v40, %v2502_v52 }
 0x31a   : > { %v2505_v30 = vsub.f32 %v2483_v10, %v2502_v52  ;;  %v2506_v27 = vsub.f32 %v2484_v35, %v2502_v52  ;;  %v2550_v54 = vpop.permute.xlu1 %2549 }
 0x31b   : > { %v2513_v47 = vmul.f32 %v2507_v28, %v2507_v28  ;;  %v2514_v16 = vmul.f32 %v2508_v9, %v2508_v9  ;;  %v2510_v29 = vmul.f32 %v2504_v12, %v2504_v12  ;;  %v2515_v31 = vmul.f32 %v2509_v17, %v2509_v17 }
 0x31c   : > { %v2511_v42 = vmul.f32 %v2505_v30, %v2505_v30  ;;  %v2512_v33 = vmul.f32 %v2506_v27, %v2506_v27 }
 0x31d   : > { %v2519_v34 = vmul.f32 %v2513_v47, %v5643_v46  ;;  %v2520_v2 = vmul.f32 %v2514_v16, %v5664_v50  ;;  %v2516_v4 = vmul.f32 %v2510_v29, %v5643_v46  ;;  %v2521_v13 = vmul.f32 %v2515_v31, %v5611_v32 }
 0x31e   : > { %v2517_v7 = vmul.f32 %v2511_v42, %v5664_v50  ;;  %v2518_v10 = vmul.f32 %v2512_v33, %v5611_v32  ;;  %v2545_v55 = vpop.permute.xlu0 %2544 }
 0x31f   : > { %v2526_v40 = vadd.f32 %v2520_v2, %v2519_v34 }
 0x320   : > { %v2522_v20 = vadd.f32 %v2517_v7, %v2516_v4 }
 0x321   : > { %v2527_v24 = vadd.f32 %v2526_v40, %v2521_v13 }
 0x322   : > { %v2523_v39 = vadd.f32 %v2522_v20, %v2518_v10  ;;  %v6019_v20 = vld [vmem:[%s6495_s7 + $0x10] sm:$0xff] }
 0x323   : > { %2528 = vadd.xlane.f32.xlu1 %v2527_v24  ;;  %4752 = vmatprep.mubr.msk.f32.mxu1 %vm2633_vm14, %v6019_v20 }
 0x324   : > { %2524 = vadd.xlane.f32.xlu0 %v2523_v39 }
 0x334   : > { %2560 = vperm.xlu1 %5038, %v2464_v37  }
 0x33a   : > { %2565 = vperm.xlu0 %5037, %v2465_v53  }
 0x3b0   : > { %v2529_v51 = vpop.xlane.xlu1 %2528 }
 0x3b1   : > { %v2525_v6 = vpop.xlane.xlu0 %2524  ;;  %v2531_v41 = vmul.f32 0.00390625, %v2529_v51 }
 0x3b2   : > { %v2530_v43 = vmul.f32 0.00390625, %v2525_v6 }
 0x3b3   : > { %v2533_v25 = vadd.f32 1e-05, %v2531_v41 }
 0x3b4   : > { %v2532_v35 = vadd.f32 1e-05, %v2530_v43  ;;  %v2561_v47 = vpop.permute.xlu1 %2560 }
 0x3b5   : > { %5159 = vrsqrt.f32 %v2533_v25 }
 0x3b6   : > { %5161 = vrsqrt.f32 %v2532_v35 }
 0x3b9   : > { %v2566_v52 = vpop.permute.xlu0 %2565 }
 0x3bf   : > { %v5160_v15 = vpop.eup %5159 }
 0x3c0   : > { %v5162_v44 = vpop.eup %5161  ;;  %v2539_v61 = vmul.f32 %v5160_v15, %v2507_v28  ;;  %v2540_v5 = vmul.f32 %v5160_v15, %v2508_v9  ;;  %v2541_v62 = vmul.f32 %v5160_v15, %v2509_v17  ;;  %v4228_v15 = vld [vmem:[%s6496_s8 + $0x8] sm:$0xff] }
 0x3c1   : > { %v2536_v23 = vmul.f32 %v5162_v44, %v2504_v12  ;;  %v2537_v45 = vmul.f32 %v5162_v44, %v2505_v30  ;;  %v2538_v3 = vmul.f32 %v5162_v44, %v2506_v27  ;;  %v4227_v44 = vld [vmem:[%s6496_s8] sm:$0xff] }
 0x3c2   : > { %v2555_v18 = vmul.f32 %v2550_v54, %v2539_v61  ;;  %v2556_v36 = vmul.f32 %v2550_v54, %v2540_v5  ;;  %v2557_v21 = vmul.f32 %v2550_v54, %v2541_v62  ;;  %v4246_v61 = vld [vmem:[%s6497_s9 + $0x8] sm:$0xff]  ;;  %v4245_v5 = vld [vmem:[%s6497_s9] sm:$0xff] }
 0x3c3   : > { %v2552_v48 = vmul.f32 %v2545_v55, %v2536_v23  ;;  %v2553_v49 = vmul.f32 %v2545_v55, %v2537_v45  ;;  %v2554_v19 = vmul.f32 %v2545_v55, %v2538_v3 }
 0x3c4   : > { %v2571_v16 = vadd.f32 %v2566_v52, %v2555_v18  ;;  %v2572_v29 = vadd.f32 %v2566_v52, %v2556_v36  ;;  %v2573_v31 = vadd.f32 %v2566_v52, %v2557_v21 }
 0x3c5   : > { %v2568_v42 = vadd.f32 %v2561_v47, %v2552_v48  ;;  %v2569_v33 = vadd.f32 %v2561_v47, %v2553_v49  ;;  %v2570_v34 = vadd.f32 %v2561_v47, %v2554_v19 }
 0x3c6   : > { %v2577_v28 = vmul.f32 0.2, %v2571_v16  ;;  %v2578_v9 = vmul.f32 0.2, %v2572_v29  ;;  %v2579_v17 = vmul.f32 0.2, %v2573_v31 }
 0x3c7   : > { %v2574_v12 = vmul.f32 0.2, %v2568_v42  ;;  %v2575_v30 = vmul.f32 0.2, %v2569_v33  ;;  %v2576_v27 = vmul.f32 0.2, %v2570_v34 }
 0x3c8   : > { %v2584_v2 = vmax.f32 %v2572_v29, %v2578_v9  ;;  %v2585_v4 = vmax.f32 %v2573_v31, %v2579_v17  ;;  %v2583_v53 = vmax.f32 %v2571_v16, %v2577_v28 }
 0x3c9   : > { %v2581_v7 = vmax.f32 %v2569_v33, %v2575_v30  ;;  %v2582_v13 = vmax.f32 %v2570_v34, %v2576_v27  ;;  %v2580_v24 = vmax.f32 %v2568_v42, %v2574_v12  ;;  %v6094_v42 = vld [vmem:[%s6495_s7 + $0x18] sm:$0xff]  ;;  %v6109_v12 = vld [vmem:[%s6495_s7] sm:$0xff] }
 0x3ca   : > { %v6013_v40 = vmul.f32 %v2584_v2, %v5664_v50  ;;  %v2591_v10 = vmul.f32 %v2585_v4, %v5611_v32  ;;  %v6033_v6 = vmul.f32 %v2583_v53, %v5643_v46 }
 0x3cb   : > { %v6022_v39 = vmul.f32 %v2581_v7, %v5664_v50  ;;  %v2588_v37 = vmul.f32 %v2582_v13, %v5611_v32  ;;  %v6030_v51 = vmul.f32 %v2580_v24, %v5643_v46 }
 0x3cd   : > { %v5044_v54 = vpack.i.bf16 %v2591_v10, %v2588_v37  ;;  %v5039_v55 = vpack.i.bf16 %v6013_v40, %v6022_v39  ;;  %v4843_v41 = vpack.c.bf16 %v6013_v40, %v6022_v39  ;;  %v4845_v43 = vpack.c.bf16 %v6033_v6, %v6030_v51  ;;  %v6203_v39 = vld [vmem:[%s6495_s7 + $0x38] sm:$0xff] }
 0x3ce   : > { %v6043_v25 = vpack.c.bf16 %v2591_v10, %v2588_v37  ;;  %v5094_v35 = vpack.i.bf16 %v6033_v6, %v6030_v51 }
 0x3cf   : > { %5045 = vrot.lane.b32.xlu0 %v5044_v54, %s6529_s21  ;;  %5040 = vrot.lane.b32.xlu1 %v5039_v55, %s6529_s21 }
 0x3d3   : > { %5055 = vrot.lane.b32.xlu0 %v5044_v54, %s6528_s22  ;;  %5050 = vrot.lane.b32.xlu1 %v5039_v55, %s6528_s22 }
 0x3d7   : > { %5065 = vrot.lane.b32.xlu0 %v5044_v54, %s6532_s20  ;;  %5060 = vrot.lane.b32.xlu1 %v5039_v55, %s6532_s20 }
 0x3db   : > { %5075 = vrot.lane.b32.xlu0 %v5044_v54, %s6533_s23  ;;  %5070 = vrot.lane.b32.xlu1 %v5039_v55, %s6533_s23 }
 0x3df   : > { %5085 = vrot.lane.b32.xlu0 %v5044_v54, %s6534_s24  ;;  %5080 = vrot.lane.b32.xlu1 %v5039_v55, %s6534_s24 }
 0x3e3   : > { %5095 = vrot.lane.b32.xlu0 %v5094_v35, %s6529_s21  ;;  %5090 = vrot.lane.b32.xlu1 %v5094_v35, %s6534_s24  ;;  %s513_s24 = sand.u32 1, %s5223_s26  }
 0x3e7   : > { %5105 = vrot.lane.b32.xlu0 %v5044_v54, %s6535_s1  ;;  %5100 = vrot.lane.b32.xlu1 %v5039_v55, %s6535_s1 }
 0x3eb   : > { %5115 = vrot.lane.b32.xlu0 %v5094_v35, %s6528_s22  ;;  %5110 = vrot.lane.b32.xlu1 %v5094_v35, %s6535_s1  ;;  %s4979_s22 = smul.u32 48, %s513_s24 }
 0x3ed   : > { %s515_s1 = scalar_lea.vmem [#allocation2], %s4979_s22 }
 0x3ef   : > { %5125 = vrot.lane.b32.xlu0 %v5044_v54, %s6527_s30  ;;  %5120 = vrot.lane.b32.xlu1 %v5039_v55, %s6527_s30 }
 0x3f3   : > { %5135 = vrot.lane.b32.xlu0 %v5094_v35, %s6532_s20  ;;  %5130 = vrot.lane.b32.xlu1 %v5094_v35, %s6527_s30  ;;  %s4392_s20 = sshll.u32 %s515_s1, 4  ;;  %s6442_s20 = int_to_ptr.vmem [resolvable:$true] %s4392_s20 }
 0x3f4   : > { %s5169_s2 = scalar_lea.vmem %s6442_s20, 768 }
 0x3f5   : > { %p5170_p12 = scmp.ne.s32.totalorder %s6442_s20, %s5169_s2 }
 0x3f7   : > { %5145 = vrot.lane.b32.xlu0 %v5039_v55, %s6530_s15  ;;  %5140 = vrot.lane.b32.xlu1 %v5094_v35, %s6533_s23  ;;  %s544_s23 = scalar_lea.vmem %s6498_s10, %s5996_s16  ;;  %p5171_p13 = pnand %p5170_p12, %p5358_p5 }
 0x3f9   : > { %p5172_p0 = pneg %p5171_p13 }
 0x3fb   : > { %5155 = vrot.lane.b32.xlu0 %v5094_v35, %s6530_s15  ;;  %5150 = vrot.lane.b32.xlu1 %v5044_v54, %s6530_s15  ;;  %s550_s15 = scalar_lea.vmem %s6499_s11, %s5996_s16  ;;  %s4981_s16 = smul.u32 768, %s5341_s29 }
 0x3fd   : > { %s6440_s29 = scalar_lea.hbm %s6501_s13, %s4981_s16 }
 0x3ff   : > { %4236 = vperm.xlu0 %5037, %v4228_v15   ;;  %4231 = vperm.xlu1 %5038, %v4227_v44   ;;  %v6132_v15 = vld [vmem:[%s6495_s7 + $0x8] sm:$0xff] }
 0x403   : > { %4258 = vperm.xlu0 %5037, %v4246_v61   ;;  %4253 = vperm.xlu1 %5038, %v4245_v5  }
 0x441   : > { %v5046_v62 = vpop.permute.xlu0 %5045  ;;  %v6079_v23 = vpop.permute.xlu1 %5040 }
 0x442   : > { %v5048_v45 = vunpack.i.h.bf16 %v5046_v62  ;;  %v5047_v3 = vunpack.i.l.bf16 %v5046_v62  ;;  %v5043_v18 = vunpack.i.h.bf16 %v6079_v23  ;;  %v5042_v36 = vunpack.i.l.bf16 %v6079_v23 }
 0x444   : > { %v2627_v21 = vsel %vm2234_vm9, %v5042_v36, %v5047_v3  ;;  %v2628_v48 = vsel %vm2234_vm9, %v5043_v18, %v5048_v45  ;;  %v6149_v45 = vld [vmem:[%s6495_s7 + $0x20] sm:$0xff] }
 0x445   : > { %v5056_v49 = vpop.permute.xlu0 %5055  ;;  %v6087_v19 = vpop.permute.xlu1 %5050  ;;  %v4815_v52 = vpack.c.bf16 %v2628_v48, %v2627_v21 }
 0x446   : > { %v5058_v47 = vunpack.i.h.bf16 %v5056_v49  ;;  %v5057_v16 = vunpack.i.l.bf16 %v5056_v49  ;;  %v5053_v29 = vunpack.i.h.bf16 %v6087_v19  ;;  %v5052_v31 = vunpack.i.l.bf16 %v6087_v19 }
 0x447   : > { %4816 = vmatprep.subr.bf16.mxu1 %v4815_v52 }
 0x448   : > { %4818 = vmatpush3.bf16.msra.mxu1 %v4815_v52  ;;  %v2606_v33 = vsel %vm2207_vm10, %v5052_v31, %v5057_v16  ;;  %v2607_v34 = vsel %vm2207_vm10, %v5053_v29, %v5058_v47  ;;  %v6166_v16 = vld [vmem:[%s6495_s7 + $0x28] sm:$0xff] }
 0x449   : > { %v5066_v28 = vpop.permute.xlu0 %5065  ;;  %v6104_v9 = vpop.permute.xlu1 %5060  ;;  %v4823_v17 = vpack.c.bf16 %v2607_v34, %v2606_v33 }
 0x44a   : > { %v5068_v30 = vunpack.i.h.bf16 %v5066_v28  ;;  %v5067_v27 = vunpack.i.l.bf16 %v5066_v28  ;;  %v5063_v2 = vunpack.i.h.bf16 %v6104_v9  ;;  %v5062_v4 = vunpack.i.l.bf16 %v6104_v9 }
 0x44b   : > { %4753 = vmatmul.mubr.msk.f32.vlgmr.msra.gmra.mrb[2].mxu1 %vm2633_vm14, %v6094_v42  ;;  %4824 = vmatprep.subr.bf16.mxu1 %v4823_v17 }
 0x44c   : > { %4826 = vmatpush3.bf16.msra.mxu1 %v4823_v17  ;;  %v2965_v7 = vsel %vm2267_vm12, %v5062_v4, %v5067_v27  ;;  %v2966_v13 = vsel %vm2267_vm12, %v5063_v2, %v5068_v30  ;;  %4759 = vmatprep.mubr.msk.f32.mxu1 %vm2633_vm14, %v6109_v12  ;;  %v6179_v30 = vld [vmem:[%s6495_s7 + $0x30] sm:$0xff] }
 0x44d   : > { %v5076_v10 = vpop.permute.xlu0 %5075  ;;  %v6125_v24 = vpop.permute.xlu1 %5070  ;;  %v4831_v37 = vpack.c.bf16 %v2966_v13, %v2965_v7 }
 0x44e   : > { %v5078_v53 = vunpack.i.h.bf16 %v5076_v10  ;;  %v5077_v54 = vunpack.i.l.bf16 %v5076_v10  ;;  %v5073_v55 = vunpack.i.h.bf16 %v6125_v24  ;;  %v5072_v35 = vunpack.i.l.bf16 %v6125_v24  ;;  %v4610_v24 = vld [vmem:[%s6495_s7 + $0x50] sm:$0xff] }
 0x44f   : > { %4832 = vmatprep.subr.bf16.mxu1 %v4831_v37 }
 0x450   : > { %v3150_v44 = vsel %vm2300_vm11, %v5072_v35, %v5077_v54  ;;  %v3151_v61 = vsel %vm2300_vm11, %v5073_v55, %v5078_v53 }
 0x451   : > { %v6142_v5 = vpop.permute.xlu0 %5085  ;;  %v6144_v62 = vpop.permute.xlu1 %5080  ;;  %v4839_v23 = vpack.c.bf16 %v3151_v61, %v3150_v44 }
 0x452   : > { %v5088_v10 = vunpack.i.h.bf16 %v6142_v5  ;;  %v5083_v53 = vunpack.i.h.bf16 %v6144_v62  ;;  %v5082_v54 = vunpack.i.l.bf16 %v6144_v62 }
 0x453   : > { %4760 = vmatmul.mubr.msk.f32.vlgmr.msra.gmra.mrb[2].mxu1 %vm2633_vm14, %v6132_v15 }
 0x454   : > { %4834 = vmatpush3.bf16.msra.mxu1 %v4831_v37  ;;  %4766 = vmatprep.mubr.msk.f32.mxu1 %vm2633_vm14, %v6149_v45  ;;  %v5087_v37 = vunpack.i.l.bf16 %v6142_v5 }
 0x455   : > { %4840 = vmatprep.subr.bf16.mxu1 %v4839_v23  ;;  %v5096_v3 = vpop.permute.xlu0 %5095  ;;  %v6155_v21 = vpop.permute.xlu1 %5090 }
 0x456   : > { %v5098_v48 = vunpack.i.h.bf16 %v5096_v3  ;;  %v5097_v49 = vunpack.i.l.bf16 %v5096_v3  ;;  %v3504_v19 = vsel %vm579_vm1, %v5082_v54, %v5087_v37  ;;  %v5092_v3 = vunpack.i.l.bf16 %v6155_v21 }
 0x458   : > { %v2632_v52 = vsel %vm2234_vm9, %v5731_v58, %v5098_v48  ;;  %v2631_v47 = vsel %vm2234_vm9, %v5731_v58, %v5097_v49  ;;  %v2629_v28 = vsel %vm2234_vm9, %v5097_v49, %v5042_v36  ;;  %v2630_v17 = vsel %vm2234_vm9, %v5098_v48, %v5043_v18 }
 0x459   : > { %v6168_v33 = vpop.permute.xlu0 %5105  ;;  %v6170_v34 = vpop.permute.xlu1 %5100  ;;  %v4813_v58 = vpack.c.bf16 %v2632_v52, %v2631_v47  ;;  %v4811_v27 = vpack.c.bf16 %v2630_v17, %v2629_v28  ;;  %v4605_v52 = vld [vmem:[%s6495_s7 + $0x48] sm:$0xff]  ;;  %v3502_v47 = vsel %vm579_vm1, %v5087_v37, %v5739_v59  ;;  %v3503_v28 = vsel %vm579_vm1, %v5088_v10, %v5739_v59 }
 0x45a   : > { %v5107_v59 = vunpack.i.l.bf16 %v6168_v33 }
 0x45b   : > { %4767 = vmatmul.mubr.msk.f32.vlgmr.msra.gmra.mrb[2].mxu1 %vm2633_vm14, %v6166_v16  ;;  %4812 = vmatprep.subr.bf16.mxu0 %v4811_v27  ;;  %v5108_v27 = vunpack.i.h.bf16 %v6168_v33 }
 0x45c   : > { %4842 = vmatpush3.bf16.msra.mxu1 %v4839_v23  ;;  %4773 = vmatprep.mubr.msk.f32.mxu1 %vm2633_vm14, %v6179_v30 }
 0x45d   : > { %4844 = vmatprep.subr.bf16.mxu1 %v4843_v41  ;;  %v5116_v18 = vpop.permute.xlu0 %5115  ;;  %v6188_v36 = vpop.permute.xlu1 %5110  ;;  %4814 = vmatpush1.bf16.msra.mxu0 %v4813_v58 }
 0x45e   : > { %v5118_v7 = vunpack.i.h.bf16 %v5116_v18  ;;  %v5117_v13 = vunpack.i.l.bf16 %v5116_v18 }
 0x460   : > { %v2611_v44 = vsel %vm2207_vm10, %v5723_v56, %v5118_v7  ;;  %v2610_v40 = vsel %vm2207_vm10, %v5723_v56, %v5117_v13  ;;  %4584 = vmatmul.mubr.msk.f32.vlgmr.msra.gmra.mrb[6].mxu0 %vm2633_vm14, %v6019_v20  ;;  %v2608_v5 = vsel %vm2207_vm10, %v5117_v13, %v5052_v31  ;;  %v2609_v56 = vsel %vm2207_vm10, %v5118_v7, %v5053_v29  ;;  %v4604_v20 = vld [vmem:[%s6495_s7 + $0x40] sm:$0xff] }
 0x461   : > { %v6207_v41 = vpop.permute.xlu0 %5125  ;;  %v6209_v61 = vpop.permute.xlu1 %5120  ;;  %v4821_v62 = vpack.c.bf16 %v2611_v44, %v2610_v40  ;;  %2710 = vmatprep.mubr.f32.mxu0 %v5233_v1  ;;  %v4819_v23 = vpack.c.bf16 %v2609_v56, %v2608_v5  ;;  %v3505_v29 = vsel %vm579_vm1, %v5083_v53, %v5088_v10  ;;  %v5093_v31 = vunpack.i.h.bf16 %v6155_v21  ;;  %v4611_v56 = vld [vmem:[%s6495_s7 + $0x58] sm:$0xff] }
 0x462   : > { %v4851_v49 = vpack.c.bf16 %v3505_v29, %v3504_v19  ;;  %v5103_v13 = vunpack.i.h.bf16 %v6170_v34  ;;  %v4855_v44 = vpack.c.bf16 %v3503_v28, %v3502_v47  ;;  %v5112_v40 = vunpack.i.l.bf16 %v6188_v36 }
 0x463   : > { %4774 = vmatmul.mubr.msk.f32.vlgmr.msra.gmra.mrb[2].mxu1 %vm2633_vm14, %v6203_v39  ;;  %4820 = vmatprep.subr.bf16.mxu0 %v4819_v23  ;;  %v3507_v17 = vsel %vm579_vm1, %v5093_v31, %v5083_v53  ;;  %v3688_v23 = vsel %vm2377_vm13, %v5108_v27, %v5747_v63  ;;  %v5127_v19 = vunpack.i.l.bf16 %v6207_v41  ;;  %v5122_v29 = vunpack.i.l.bf16 %v6209_v61 }
 0x464   : > { %4846 = vmatpush1.bf16.msra.mxu1 %v4845_v43  ;;  %3393 = vmatprep.mubr.f32.mxu1 %v5233_v1 }
 0x465   : > { %4585 = vmatmul.mubr.msk.f32.gmra.mrb[8].mxu0 %vm2633_vm14, %v6094_v42  ;;  %v5136_v51 = vpop.permute.xlu0 %5135  ;;  %v6237_v6 = vpop.permute.xlu1 %5130  ;;  %4848 = vmatprep.subr.bf16.mxu1 %v6043_v25  ;;  %v3872_v47 = vsel %vm1090_vm3, %v5127_v19, %v5749_v0 }
 0x466   : > { %4822 = vmatpush1.bf16.msra.mxu0 %v4821_v62  ;;  %v5138_v43 = vunpack.i.h.bf16 %v5136_v51  ;;  %v5137_v48 = vunpack.i.l.bf16 %v5136_v51  ;;  %2862 = vmatprep.mubr.f32.mxu0 %v5233_v1  ;;  %v5132_v51 = vunpack.i.l.bf16 %v6237_v6 }
 0x467   : > { %4606 = vmatmul.mubr.msk.f32.vlgmr.msra.gmra.mrb[4].mxu1 %vm2633_vm14, %v4604_v20 }
 0x468   : > { %v2970_v21 = vsel %vm2267_vm12, %v5729_v57, %v5138_v43  ;;  %v2969_v42 = vsel %vm2267_vm12, %v5729_v57, %v5137_v48  ;;  %4850 = vmatpush3.bf16.msra.mxu1 %v6043_v25  ;;  %v3506_v57 = vsel %vm579_vm1, %v5092_v3, %v5082_v54  ;;  %v2967_v58 = vsel %vm2267_vm12, %v5137_v48, %v5062_v4  ;;  %v4617_v48 = vld [vmem:[%s6495_s7 + $0x68] sm:$0xff] }
 0x469   : > { %4588 = vmatmul.mubr.msk.f32.vlgmr.msra.gmra.mrb[6].mxu0 %vm2633_vm14, %v6109_v12  ;;  %4852 = vmatprep.subr.bf16.mxu1 %v4851_v49  ;;  %v5141_v25 = vpop.permute.xlu1 %5140  ;;  %v5102_v12 = vunpack.i.l.bf16 %v6170_v34  ;;  %v4829_v10 = vpack.c.bf16 %v2970_v21, %v2969_v42  ;;  %v2968_v4 = vsel %vm2267_vm12, %v5138_v43, %v5063_v2  ;;  %v4853_v34 = vpack.c.bf16 %v3507_v17, %v3506_v57  ;;  %v5146_v21 = vpop.permute.xlu0 %5145 }
 0x46a   : > { %v5143_v18 = vunpack.i.h.bf16 %v5141_v25  ;;  %v5142_v7 = vunpack.i.l.bf16 %v5141_v25  ;;  %3399 = vmatprep.mubr.f32.mxu1 %v5233_v1  ;;  %2868 = vmatprep.mubr.f32.mxu0 %v5233_v1  ;;  %v4827_v53 = vpack.c.bf16 %v2968_v4, %v2967_v58  ;;  %v5148_v57 = vunpack.i.h.bf16 %v5146_v21 }
 0x46b   : > { %4607 = vmatmul.mubr.msk.f32.gmra.mrb[6].mxu1 %vm2633_vm14, %v4605_v52  ;;  %v5147_v25 = vunpack.i.l.bf16 %v5146_v21 }
 0x46c   : > { %v3155_v33 = vsel %vm2300_vm11, %v5741_v60, %v5143_v18  ;;  %v3154_v37 = vsel %vm2300_vm11, %v5741_v60, %v5142_v7  ;;  %4780 = vmatprep.mubr.msk.f32.mxu1 %vm2633_vm14, %v4604_v20  ;;  %v3152_v9 = vsel %vm2300_vm11, %v5142_v7, %v5072_v35  ;;  %v3153_v2 = vsel %vm2300_vm11, %v5143_v18, %v5073_v55 }
 0x46d   : > { %4589 = vmatmul.mubr.msk.f32.gmra.mrb[8].mxu0 %vm2633_vm14, %v6132_v15  ;;  %4828 = vmatprep.subr.bf16.mxu0 %v4827_v53  ;;  %v4837_v60 = vpack.c.bf16 %v3155_v33, %v3154_v37  ;;  %v4835_v54 = vpack.c.bf16 %v3153_v2, %v3152_v9  ;;  %v3689_v55 = vsel %vm2377_vm13, %v5102_v12, %v5107_v59  ;;  %v5113_v15 = vunpack.i.h.bf16 %v6188_v36  ;;  %v5151_v49 = vpop.permute.xlu1 %5150 }
 0x46e   : > { %3041 = vmatprep.mubr.f32.mxu0 %v5233_v1  ;;  %4830 = vmatpush1.bf16.msra.mxu0 %v4829_v10  ;;  %v3690_v35 = vsel %vm2377_vm13, %v5103_v13, %v5108_v27  ;;  %v3691_v36 = vsel %vm2377_vm13, %v5112_v40, %v5102_v12  ;;  %v5128_v20 = vunpack.i.h.bf16 %v6207_v41  ;;  %v3874_v41 = vsel %vm1090_vm3, %v5122_v29, %v5127_v19  ;;  %v5156_v27 = vpop.permute.xlu0 %5155  ;;  %v4623_v10 = vld [vmem:[%s6495_s7 + $0x78] sm:$0xff] }
 0x46f   : > { %4781 = vmatmul.mubr.msk.f32.vlgmr.msra.gmra.mrb[2].mxu1 %vm2633_vm14, %v4605_v52  ;;  %4836 = vmatprep.subr.bf16.mxu0 %v4835_v54  ;;  %v4859_v5 = vpack.c.bf16 %v3690_v35, %v3689_v55  ;;  %v3692_v62 = vsel %vm2377_vm13, %v5113_v15, %v5103_v13  ;;  %v5152_v52 = vunpack.i.l.bf16 %v5151_v49  ;;  %v5158_v7 = vunpack.i.h.bf16 %v5156_v27 }
 0x470   : > { %4854 = vmatpush1.bf16.msra.mxu1 %v4853_v34  ;;  %3578 = vmatprep.mubr.f32.mxu1 %v5233_v1  ;;  %v4861_v31 = vpack.c.bf16 %v3692_v62, %v3691_v36  ;;  %v3873_v28 = vsel %vm1090_vm3, %v5128_v20, %v5749_v0  ;;  %v5157_v13 = vunpack.i.l.bf16 %v5156_v27  ;;  %v4628_v34 = vld [vmem:[%s6495_s7 + $0x80] sm:$0xff]  ;;  %v5167_v62 = vld [vmem:[%s5867_s0 + $0x8] sm:$0xff] }
 0x471   : > { %4856 = vmatprep.subr.bf16.mxu1 %v4855_v44  ;;  %4594 = vmatmul.mubr.msk.f32.vlgmr.msra.gmra.mrb[6].mxu0 %vm2633_vm14, %v6149_v45  ;;  %v3687_v45 = vsel %vm2377_vm13, %v5107_v59, %v5747_v63  ;;  %v4616_v63 = vld [vmem:[%s6495_s7 + $0x60] sm:$0xff]  ;;  %v4871_v58 = vpack.c.bf16 %v3873_v28, %v3872_v47  ;;  %v4622_v59 = vld [vmem:[%s6495_s7 + $0x70] sm:$0xff]  ;;  %v4059_v18 = vsel %vm1269_vm4, %v5147_v25, %v5152_v52 }
 0x472   : > { %4838 = vmatpush1.bf16.msra.mxu0 %v4837_v60  ;;  %3047 = vmatprep.mubr.f32.mxu0 %v5233_v1  ;;  %v4863_v3 = vpack.c.bf16 %v3688_v23, %v3687_v45  ;;  %v4061_v4 = vsel %vm1269_vm4, %v5157_v13, %v5147_v25  ;;  %v4062_v33 = vsel %vm1269_vm4, %v5158_v7, %v5148_v57  ;;  %v4247_v7 = vld [vmem:[%s544_s23] sm:$0xff] }
 0x473   : > { %4612 = vmatmul.mubr.msk.f32.vlgmr.msra.gmra.mrb[4].mxu1 %vm2633_vm14, %v4610_v24  ;;  %v4057_v37 = vsel %vm1269_vm4, %v5152_v52, %v5975_v38  ;;  %v4877_v9 = vpack.c.bf16 %v4062_v33, %v4061_v4 }
 0x474   : > { %4858 = vmatpush3.bf16.msra.mxu1 %v4855_v44  ;;  %3584 = vmatprep.mubr.f32.mxu1 %v5233_v1 }
 0x475   : > { %4860 = vmatprep.subr.bf16.mxu1 %v4859_v5  ;;  %4595 = vmatmul.mubr.msk.f32.gmra.mrb[8].mxu0 %vm2633_vm14, %v6166_v16  ;;  %v5123_v16 = vunpack.i.h.bf16 %v6209_v61 }
 0x476   : > { %3226 = vmatprep.mubr.f32.mxu0 %v5233_v1 }
 0x477   : > { %4613 = vmatmul.mubr.msk.f32.gmra.mrb[6].mxu1 %vm2633_vm14, %v4611_v56  ;;  %v3875_v61 = vsel %vm1090_vm3, %v5123_v16, %v5128_v20 }
 0x478   : > { %4787 = vmatprep.mubr.msk.f32.mxu1 %vm2633_vm14, %v4610_v24  ;;  %v4867_v43 = vpack.c.bf16 %v3875_v61, %v3874_v41  ;;  %v5168_v41 = vld [vmem:[%s5867_s0 + $0x18] sm:$0xff] }
 0x479   : > { %4600 = vmatmul.mubr.msk.f32.vlgmr.msra.gmra.mrb[6].mxu0 %vm2633_vm14, %v6179_v30  ;;  %v5133_v30 = vunpack.i.h.bf16 %v6237_v6  ;;  %v5153_v6 = vunpack.i.h.bf16 %v5151_v49 }
 0x47a   : > { %3232 = vmatprep.mubr.f32.mxu0 %v5233_v1 }
 0x47b   : > { %4788 = vmatmul.mubr.msk.f32.vlgmr.msra.gmra.mrb[2].mxu1 %vm2633_vm14, %v4611_v56  ;;  %v3877_v42 = vsel %vm1090_vm3, %v5133_v30, %v5123_v16  ;;  %v4060_v0 = vsel %vm1269_vm4, %v5148_v57, %v5153_v6  ;;  %v4058_v53 = vsel %vm1269_vm4, %v5153_v6, %v5975_v38 }
 0x47c   : > { %4862 = vmatpush1.bf16.msra.mxu1 %v4861_v31  ;;  %3763 = vmatprep.mubr.f32.mxu1 %v5233_v1  ;;  %v4875_v12 = vpack.c.bf16 %v4060_v0, %v4059_v18  ;;  %v4879_v2 = vpack.c.bf16 %v4058_v53, %v4057_v37  ;;  %v4248_v0 = vld [vmem:[%s544_s23 + $0x8] sm:$0xff]  ;;  %s6446_s23 = scalar_lea.sflag [#allocation3], %s513_s24 }
 0x47d   : > { %4864 = vmatprep.subr.bf16.mxu1 %v4863_v3  ;;  %4601 = vmatmul.mubr.msk.f32.gmra.mrb[8].mxu0 %vm2633_vm14, %v6203_v39  ;;  %v3876_v39 = vsel %vm1090_vm3, %v5132_v51, %v5122_v29 }
 0x47e   : > { %v4869_v17 = vpack.c.bf16 %v3877_v42, %v3876_v39  ;;  %v4232_v24 = vpop.permute.xlu1 %4231  ;;  %v4237_v55 = vpop.permute.xlu0 %4236 }
 0x47f   : > { %4618 = vmatmul.mubr.msk.f32.vlgmr.msra.gmra.mrb[4].mxu1 %vm2633_vm14, %v4616_v63 }
 0x480   : > { %4866 = vmatpush3.bf16.msra.mxu1 %v4863_v3  ;;  %3769 = vmatprep.mubr.f32.mxu1 %v5233_v1 }
 0x481   : > { %4868 = vmatprep.subr.bf16.mxu1 %v4867_v43 }
 0x482   : > { %v4254_v15 = vpop.permute.xlu1 %4253  ;;  %v4259_v45 = vpop.permute.xlu0 %4258 }
 0x483   : > { %4619 = vmatmul.mubr.msk.f32.gmra.mrb[6].mxu1 %vm2633_vm14, %v4617_v48  ;;  %v4261_v36 = vmul.f32 %v4254_v15, %v5951_v8  ;;  %v4262_v23 = vmul.f32 %v5167_v62, %v4254_v15  ;;  %v4264_v61 = vmul.f32 %v5168_v41, %v4259_v45  ;;  %v4265_v51 = vmul.f32 %v4259_v45, %v5948_v11 }
 0x484   : > { %4794 = vmatprep.mubr.msk.f32.mxu1 %vm2633_vm14, %v4616_v63  ;;  %v4266_v49 = vmul.f32 %v4259_v45, %v5970_v22  ;;  %v4263_v8 = vmul.f32 %v4254_v15, %v5973_v26 }
 0x487   : > { %4795 = vmatmul.mubr.msk.f32.vlgmr.msra.gmra.mrb[2].mxu1 %vm2633_vm14, %v4617_v48 }
 0x488   : > { %4870 = vmatpush1.bf16.msra.mxu1 %v4869_v17  ;;  %3948 = vmatprep.mubr.f32.mxu1 %v5233_v1 }
 0x489   : > { %4872 = vmatprep.subr.bf16.mxu1 %v4871_v58 }
 0x48b   : > { %4624 = vmatmul.mubr.msk.f32.vlgmr.msra.gmra.mrb[4].mxu1 %vm2633_vm14, %v4622_v59 }
 0x48c   : > { %4874 = vmatpush3.bf16.msra.mxu1 %v4871_v58  ;;  %3954 = vmatprep.mubr.f32.mxu1 %v5233_v1 }
 0x48d   : > { %4876 = vmatprep.subr.bf16.mxu1 %v4875_v12 }
 0x48f   : > { %4625 = vmatmul.mubr.msk.f32.gmra.mrb[6].mxu1 %vm2633_vm14, %v4623_v10 }
 0x490   : > { %4801 = vmatprep.mubr.msk.f32.mxu1 %vm2633_vm14, %v4622_v59 }
 0x493   : > { %4802 = vmatmul.mubr.msk.f32.vlgmr.msra.gmra.mrb[2].mxu1 %vm2633_vm14, %v4623_v10 }
 0x494   : > { %4878 = vmatpush1.bf16.msra.mxu1 %v4877_v9  ;;  %4133 = vmatprep.mubr.f32.mxu1 %v5233_v1 }
 0x495   : > { %4880 = vmatprep.subr.bf16.mxu1 %v4879_v2 }
 0x497   : > { %4630 = vmatmul.mubr.msk.f32.vlgmr.msra.gmra.mrb[4].mxu1 %vm2633_vm14, %v4628_v34 }
 0x498   : > { %4882 = vmatpush3.bf16.msra.mxu1 %v4879_v2  ;;  %4139 = vmatprep.mubr.f32.mxu1 %v5233_v1 }
 0x49b   : > { %4631 = vmatmul.mubr.msk.f32.gmra.mrb[6].mxu1 %vm2633_vm14, %v4629_v14 }
 0x49c   : > { %4808 = vmatprep.mubr.msk.f32.mxu1 %vm2633_vm14, %v4628_v34 }
 0x49f   : > { %4809 = vmatmul.mubr.msk.f32.vlgmr.msra.gmra.mrb[2].mxu1 %vm2633_vm14, %v4629_v14 }
 0x54c   : > { %v3228_v38 = vpop.f32.mrb[6].mxu0 }
 0x54d   : > { %v3230_v60 = vpop.f32.mrb[7].mxu0 }
 0x550   : > { %v3234_v54 = vpop.f32.mrb[8].mxu0 }
 0x551   : > { %v3236_v44 = vpop.f32.mrb[9].mxu0 }
 0x56a   : > { %v4135_v35 = vpop.f32.mrb[4].mxu1 }
 0x56b   : > { %v4885_v1 = vadd.f32 %v4135_v35, %v3228_v38  ;;  %v4137_v40 = vpop.f32.mrb[5].mxu1 }
 0x56c   : > { %v4886_v5 = vadd.f32 %v4137_v40, %v3230_v60 }
 0x56d   : > { %v4239_v56 = vadd.f32 %v4885_v1, %v4232_v24 }
 0x56e   : > { %v4240_v20 = vadd.f32 %v4886_v5, %v4232_v24  ;;  %v4141_v19 = vpop.f32.mrb[6].mxu1 }
 0x56f   : > { %v4887_v16 = vadd.f32 %v4141_v19, %v3234_v54  ;;  %v4143_v29 = vpop.f32.mrb[7].mxu1  ;;  %v4267_v31 = vadd.f32 %v4261_v36, %v4239_v56 }
 0x570   : > { %v4268_v3 = vadd.f32 %v4262_v23, %v4240_v20  ;;  %v4888_v63 = vadd.f32 %v4143_v29, %v3236_v44  ;;  %v4249_v23 = vld [vmem:[%s550_s15] sm:$0xff] }
 0x571   : > { %v4242_v30 = vadd.f32 %v4887_v16, %v4237_v55  ;;  %v4273_v6 = vmul.f32 %v4267_v31, %v5643_v46 }
 0x572   : > { %v4243_v43 = vadd.f32 %v4888_v63, %v4237_v55  ;;  %v4810_v48 = vpop.f32.mrb[2].mxu1  ;;  %v4274_v52 = vmul.f32 %v4268_v3, %v5664_v50 }
 0x573   : > { %v4270_v21 = vadd.f32 %v4264_v61, %v4242_v30  ;;  %v4244_v39 = vadd.f32 %v4810_v48, %v4237_v55  ;;  %v4212_v42 = vpop.f32.mrb[3].mxu1 }
 0x574   : > { %v4271_v47 = vadd.f32 %v4265_v51, %v4243_v43  ;;  %v4241_v28 = vadd.f32 %v4232_v24, %v4212_v42  ;;  %v4279_v27 = vadd.f32 %v4274_v52, %v4273_v6 }
 0x575   : > { %v4276_v17 = vmul.f32 %v4270_v21, %v5643_v46  ;;  %v4272_v57 = vadd.f32 %v4266_v49, %v4244_v39 }
 0x576   : > { %v4277_v11 = vmul.f32 %v4271_v47, %v5664_v50  ;;  %v4269_v25 = vadd.f32 %v4263_v8, %v4241_v28 }
 0x577   : > { %v4278_v22 = vmul.f32 %v4272_v57, %v5611_v32 }
 0x578   : > { %v4275_v26 = vmul.f32 %v4269_v25, %v5611_v32  ;;  %v4283_v58 = vadd.f32 %v4277_v11, %v4276_v17 }
 0x57a   : > { %v4284_v59 = vadd.f32 %v4283_v58, %v4278_v22  ;;  %v4280_v18 = vadd.f32 %v4279_v27, %v4275_v26 }
 0x57c   : > { %4285 = vadd.xlane.f32.xlu0 %v4284_v59  ;;  %4281 = vadd.xlane.f32.xlu1 %v4280_v18 }
 0x58d   : > { %4334 = vperm.xlu1 %5038, %v4248_v0  }
 0x592   : > { %4329 = vperm.xlu0 %5037, %v4247_v7  }
 0x609   : > { %v4286_v13 = vpop.xlane.xlu0 %4285  ;;  %v4282_v12 = vpop.xlane.xlu1 %4281 }
 0x60a   : > { %v4288_v10 = vmul.f32 0.00390625, %v4286_v13  ;;  %v4287_v4 = vmul.f32 0.00390625, %v4282_v12 }
 0x60c   : > { %v4292_v33 = vsub.f32 %v4270_v21, %v4288_v10  ;;  %v4293_v37 = vsub.f32 %v4271_v47, %v4288_v10  ;;  %v4294_v53 = vsub.f32 %v4272_v57, %v4288_v10  ;;  %v4289_v9 = vsub.f32 %v4267_v31, %v4287_v4 }
 0x60d   : > { %v4290_v2 = vsub.f32 %v4268_v3, %v4287_v4  ;;  %v4291_v34 = vsub.f32 %v4269_v25, %v4287_v4 }
 0x60e   : > { %v4298_v14 = vmul.f32 %v4292_v33, %v4292_v33  ;;  %v4299_v38 = vmul.f32 %v4293_v37, %v4293_v37  ;;  %v4300_v60 = vmul.f32 %v4294_v53, %v4294_v53  ;;  %v4295_v54 = vmul.f32 %v4289_v9, %v4289_v9 }
 0x60f   : > { %v4296_v44 = vmul.f32 %v4290_v2, %v4290_v2  ;;  %v4297_v24 = vmul.f32 %v4291_v34, %v4291_v34 }
 0x610   : > { %v4304_v55 = vmul.f32 %v4298_v14, %v5643_v46  ;;  %v4305_v35 = vmul.f32 %v4299_v38, %v5664_v50  ;;  %v4301_v15 = vmul.f32 %v4295_v54, %v5643_v46  ;;  %v4306_v40 = vmul.f32 %v4300_v60, %v5611_v32  ;;  %v4250_v46 = vld [vmem:[%s550_s15 + $0x8] sm:$0xff]  ;;  %s5173_s15 = sshll.u32 %s5248_s3, 4  ;;  %s5174_s15 = int_to_ptr.vmem [resolvable:$false] %s5173_s15 }
 0x611   : > { %v4302_v1 = vmul.f32 %v4296_v44, %v5664_v50  ;;  %v4303_v56 = vmul.f32 %v4297_v24, %v5611_v32  ;;  %v4335_v50 = vpop.permute.xlu1 %4334  ;;  %v4330_v20 = vpop.permute.xlu0 %4329  ;;  %s5175_s22 = scalar_lea.vmem %s5174_s15, 1536  ;;  %p5176_p1 = scmp.lt.s32.totalorder %s6442_s20, %s5174_s15 }
 0x612   : > { %v4311_v5 = vadd.f32 %v4305_v35, %v4304_v55  ;;  %p5177_p2 = scmp.lt.s32.totalorder %s5175_s22, %s5169_s2 }
 0x613   : > { %v4307_v45 = vadd.f32 %v4302_v1, %v4301_v15 }
 0x614   : > { %v4312_v36 = vadd.f32 %v4311_v5, %v4306_v40  ;;  %p5178_p3 = por %p5177_p2, %p5176_p1 }
 0x615   : > { %v4308_v62 = vadd.f32 %v4307_v45, %v4303_v56 }
 0x616   : > { %4313 = vadd.xlane.f32.xlu1 %v4312_v36  ;;  %p5179_p4 = pnand %p5178_p3, %p5172_p0 }
 0x617   : > { %4309 = vadd.xlane.f32.xlu0 %v4308_v62 }
 0x627   : > { %4345 = vperm.xlu1 %5038, %v4249_v23  }
 0x62d   : > { %4350 = vperm.xlu0 %5037, %v4250_v46  }
 0x6a3   : > { %v4314_v19 = vpop.xlane.xlu1 %4313 }
 0x6a4   : > { %v4310_v16 = vpop.xlane.xlu0 %4309  ;;  %v4316_v32 = vmul.f32 0.00390625, %v4314_v19 }
 0x6a5   : > { %v4315_v29 = vmul.f32 0.00390625, %v4310_v16 }
 0x6a6   : > { %v4318_v31 = vadd.f32 1e-05, %v4316_v32 }
 0x6a7   : > { %v4317_v3 = vadd.f32 1e-05, %v4315_v29  ;;  %v4346_v28 = vpop.permute.xlu1 %4345 }
 0x6a8   : > { %5163 = vrsqrt.f32 %v4318_v31 }
 0x6a9   : > { %5165 = vrsqrt.f32 %v4317_v3 }
 0x6ac   : > { %v4351_v47 = vpop.permute.xlu0 %4350 }
 0x6b2   : > { %v5164_v63 = vpop.eup %5163 }
 0x6b3   : > { %v5166_v41 = vpop.eup %5165  ;;  %v4324_v61 = vmul.f32 %v5164_v63, %v4292_v33  ;;  %v4325_v30 = vmul.f32 %v5164_v63, %v4293_v37  ;;  %v4326_v51 = vmul.f32 %v5164_v63, %v4294_v53 }
 0x6b4   : > { %v4321_v43 = vmul.f32 %v5166_v41, %v4289_v9  ;;  %v4322_v48 = vmul.f32 %v5166_v41, %v4290_v2  ;;  %v4323_v49 = vmul.f32 %v5166_v41, %v4291_v34 }
 0x6b5   : > { %v4340_v8 = vmul.f32 %v4335_v50, %v4324_v61  ;;  %v4341_v21 = vmul.f32 %v4335_v50, %v4325_v30  ;;  %v4342_v39 = vmul.f32 %v4335_v50, %v4326_v51 }
 0x6b6   : > { %v4337_v42 = vmul.f32 %v4330_v20, %v4321_v43  ;;  %v4338_v6 = vmul.f32 %v4330_v20, %v4322_v48  ;;  %v4339_v52 = vmul.f32 %v4330_v20, %v4323_v49 }
 0x6b7   : > { %v4356_v17 = vadd.f32 %v4351_v47, %v4340_v8  ;;  %v4357_v57 = vadd.f32 %v4351_v47, %v4341_v21  ;;  %v4358_v11 = vadd.f32 %v4351_v47, %v4342_v39 }
 0x6b8   : > { %v4353_v25 = vadd.f32 %v4346_v28, %v4337_v42  ;;  %v4354_v22 = vadd.f32 %v4346_v28, %v4338_v6  ;;  %v4355_v26 = vadd.f32 %v4346_v28, %v4339_v52 }
 0x6b9   : > { %v4362_v58 = vmul.f32 0.2, %v4356_v17  ;;  %v4363_v27 = vmul.f32 0.2, %v4357_v57  ;;  %v4364_v59 = vmul.f32 0.2, %v4358_v11 }
 0x6ba   : > { %v4359_v18 = vmul.f32 0.2, %v4353_v25  ;;  %v4360_v0 = vmul.f32 0.2, %v4354_v22  ;;  %v4361_v7 = vmul.f32 0.2, %v4355_v26 }
 0x6bb   : > { %v4368_v13 = vmax.f32 %v4356_v17, %v4362_v58  ;;  %v4369_v12 = vmax.f32 %v4357_v57, %v4363_v27  ;;  %v4370_v10 = vmax.f32 %v4358_v11, %v4364_v59 }
 0x6bc   : > { %v4365_v4 = vmax.f32 %v4353_v25, %v4359_v18  ;;  %v4366_v33 = vmax.f32 %v4354_v22, %v4360_v0  ;;  %v4367_v37 = vmax.f32 %v4355_v26, %v4361_v7 }
 0x6bd   : > { %4374 = vst [vmem:[%s515_s1 + $0x18] sm:$0xff] %v4368_v13  ;;  %4375 = vst [vmem:[%s515_s1 + $0x20] sm:$0xff] %v4369_v12 }
 0x6be   : > { %4376 = vst [vmem:[%s515_s1 + $0x28] sm:$0xff] %v4370_v10  ;;  %4371 = vst [vmem:[%s515_s1] sm:$0xff] %v4365_v4 }
 0x6bf   : > { %4372 = vst [vmem:[%s515_s1 + $0x8] sm:$0xff] %v4366_v33  ;;  %4373 = vst [vmem:[%s515_s1 + $0x10] sm:$0xff] %v4367_v37 }
 0x6c0   : > { %5182 = shalt.err (!%p5179_p4)
}
 0x6c1   : > { %s5183_s24 = scalar_lea.hbm %s6440_s29, 768  ;;  %s5187_s0 = scalar_lea.hbm %s6501_s13, 1536 }
 0x6c2   : > { %p5184_p7 = scmp.ne.s32.totalorder %s6440_s29, %s5183_s24  ;;  %p5188_p10 = scmp.lt.u32.totalorder %s6440_s29, %s6501_s13 }
 0x6c3   : > { %p5189_p11 = scmp.lt.u32.totalorder %s5187_s0, %s5183_s24  ;;  %p5191_p13 = scmp.lt.u32.totalorder %s5183_s24, %s6440_s29 }
 0x6c4   : > { %p5185_p8 = pnand %p5184_p7, %p5358_p5 }
 0x6c5   : > { %p5190_p12 = por %p5189_p11, %p5188_p10 }
 0x6c6   : > { %p5186_p9 = pneg %p5185_p8 }
 0x6c7   : > { %p5192_p0 = por %p5191_p13, %p5190_p12 }
 0x6c9   : > { %p5193_p1 = pnand %p5192_p0, %p5186_p9 }
 0x6cb   : > { %5196 = shalt.err (!%p5193_p1)
}
 0x6cc   : > { %s5249_s2 = smov 384  }
 0x6cd   : > { %4982 = dma.vmem_to_hbm [thread:$0]  (%p5358_p5), %s6442_s20, 768, %s6440_s29, %s6446_s23, %s5249_s2, %s5249_s2, %s6529_s21  }
 0x6ce PF: > { %p4988_p2 = scmp.ge.s32.totalorder %s5231_s28, 2  ;;  %s4407_s15 = sand.u32 1, %s5219_s25  }
 0x6cf   : > { %s4408_s22 = scalar_lea.sflag [#allocation3], %s4407_s15 }
 0x6d0   : > { %p4985_p3 = pnand %p4988_p2, %p5362_p6 }
 0x6d2   : > { %5214 = dma.done.wait (!%p4985_p3), %s4408_s22, 768  }
 0x6d3   : > { %5216 = vsyncadd (!%p4985_p3), %s4408_s22, 4294966528  ;;  %p23_p4 = scmp.ge.s32.totalorder %s5345_s14, 4   ;;  %s6536_s25 = smov %s5223_s26 }
 0x6d4   : > { %s6537_s26 = smov %s5227_s27  ;;  %s6538_s27 = smov %s5356_s17 }
 0x6d5   : > { %s6539_s28 = smov %s5345_s14  ;;  %25 = sbr.rel (!%p23_p4) target bundleno = 8 (0x8), region = 138 }
 0x6dc   :  { %4413 = vsyncpa [#allocation3], 1 }
 0x6dd   :  { %4415 = vsyncpa [#allocation3 + $0x1], 1 }

</bundles_post_ra>
